<compile_context>
chip_gen: v7x
topology: tpu7x:2x2x1
jax: 0.10.0
libtpu: 0.0.40
codegen_flags: <defaults>
</compile_context>

<pallas_src>
import functools
import math

import jax
import jax.numpy as jnp
import numpy as np
from jax.experimental import pallas as pl
from jax.experimental.pallas import tpu as pltpu

BN_EPS = 1e-5
BN_SCALE = 1.0 / math.sqrt(1.0 + BN_EPS)  # eval-mode BatchNorm1d with default stats
NEG_BIG = -1e30                           # finite "-inf" for masked (padded) logits


def _getd_ht_kernel(packed_ref, u12_ref, u3r_ref, et_ref, out_ref,
                    vec_sc, m_sc, l_sc, *,
                    d_e, d_r, rank, ni, miss, n_valid, two_pass, fast, approx_recip):
    """Grid = (batch tile i, phase p, entity tile j).

    Phase 0: build the per-example target vector once per batch tile (scratch) and
             accumulate the online softmax max/sum over entity tiles.
    Phase 1: recompute the (cheap, K=d_e) logits tile and emit normalized probs.
    """
    p = pl.program_id(1)
    j = pl.program_id(2)
    tb = packed_ref.shape[0]
    tn = et_ref.shape[1]

    # ---------------- per-batch-tile HT contraction (runs once per batch tile) ----
    @pl.when(jnp.logical_and(p == 0, j == 0))
    def _build_vec():
        packed = packed_ref[...]                                  # (tb, d_r+2*d_e+rank)
        r_emb = packed[:, :d_r] * BN_SCALE                        # bnr (eval)
        e2 = packed[:, d_r:d_r + d_e] * BN_SCALE                  # bne (eval); in_drop=id
        e3 = packed[:, d_r + d_e:d_r + 2 * d_e] * BN_SCALE
        sroot = packed[:, d_r + 2 * d_e:]                         # (tb, rank) sum_s U_root

        u3r = u3r_ref[...]                                        # (tb, rank, ni) [b,r,j]=U3R[r,j,b]
        if fast:
            # Fold r_emb (sum over d) into the U12-side operand BEFORE the batched
            # matmul: full-batch MXU matmul, d_r x fewer MACs, no (tb, ni, ni) W4.
            m2 = (d_e ** 3) // ni
            u12e = jnp.dot(r_emb, u12_ref[...].astype(jnp.float32),
                           preferred_element_type=jnp.float32)    # (tb, m2*rank)
            u12e = u12e.reshape(tb, m2, rank) * sroot[:, None, :]  # sroot folded here
            w_flat = jnp.einsum('bmr,brj->bmj', u12e.astype(u3r.dtype), u3r,
                                preferred_element_type=jnp.float32)  # (tb, m2, ni)
        else:
            # Generic fallback (d_r does not divide ni): materialize W4, then fold.
            u3rs = u3r.astype(jnp.float32) * sroot[:, :, None]
            w4 = jnp.einsum('ir,brj->bij', u12_ref[...].astype(jnp.float32), u3rs,
                            preferred_element_type=jnp.float32)      # (tb, ni, ni)
            w_flat = jnp.einsum('bd,bdm->bm', r_emb, w4.reshape(tb, d_r, d_e ** 3),
                                preferred_element_type=jnp.float32)

        # W_mat[b, p, q, k] (row-major flat index == i2*ni + j)
        w_m = w_flat.reshape(tb, d_e, d_e, d_e)
        # miss contraction on the VPU (broadcast-multiply + small reductions).
        if miss == 1:          # vec[b,p] = sum_{q,k} W[b,p,q,k] e2[b,q] e3[b,k]
            t = jnp.sum(w_m * e3[:, None, None, :], axis=3)
            vec = jnp.sum(t * e2[:, None, :], axis=2)
        elif miss == 2:        # vec[b,q] = sum_{p,k} W[b,p,q,k] e2[b,p] e3[b,k]
            t = jnp.sum(w_m * e3[:, None, None, :], axis=3)
            vec = jnp.sum(t * e2[:, :, None], axis=1)
        else:                  # vec[b,k] = sum_{p,q} W[b,p,q,k] e2[b,p] e3[b,q]
            t = jnp.sum(w_m * e3[:, None, :, None], axis=2)
            vec = jnp.sum(t * e2[:, :, None], axis=1)

        vec_sc[...] = vec * BN_SCALE                              # bnw (eval); hid_drop=id
        m_sc[...] = jnp.full((tb, 1), NEG_BIG, jnp.float32)
        l_sc[...] = jnp.zeros((tb, 1), jnp.float32)

    # ---------------- logits for this entity tile (K = d_e, cheap to recompute) ----
    logits = jnp.dot(vec_sc[...].astype(et_ref.dtype), et_ref[...],
                     preferred_element_type=jnp.float32)          # (tb, tn)
    if n_valid is not None:
        col = j * tn + jax.lax.broadcasted_iota(jnp.int32, (tb, tn), 1)
        logits = jnp.where(col < n_valid, logits, NEG_BIG)

    if two_pass:
        @pl.when(p == 0)
        def _stats():                                             # online max / sum carry
            m_prev = m_sc[...]
            m_new = jnp.maximum(m_prev, jnp.max(logits, axis=-1, keepdims=True))
            l_sc[...] = (l_sc[...] * jnp.exp(m_prev - m_new)
                         + jnp.sum(jnp.exp(logits - m_new), axis=-1, keepdims=True))
            m_sc[...] = m_new

        @pl.when(p == 1)
        def _emit():
            ex = jnp.exp(logits - m_sc[...])
            out_ref[...] = (ex * pl.reciprocal(l_sc[...], approx=approx_recip)
                            ).astype(out_ref.dtype)
    else:
        m = jnp.max(logits, axis=-1, keepdims=True)
        ex = jnp.exp(logits - m)
        denom = jnp.sum(ex, axis=-1, keepdims=True)
        out_ref[...] = (ex * pl.reciprocal(denom, approx=approx_recip)).astype(out_ref.dtype)


def _pick_tb(B, max_tb=128):
    """Batch tile: multiple of 8, <= max_tb, preferring >= 2 tiles (megacore)."""
    tb = min(max_tb, 8 * ((B + 7) // 8))
    if tb >= B and B >= 16:
        tb = max(8, 8 * (((B + 1) // 2 + 7) // 8))
    return int(tb)


def prepare_getd_ht_weights(E_w, U_root, U12, U3R, P, d_r, *,
                            compute_dtype=jnp.bfloat16, max_tb=128, max_tn=2048):
    """One-time, input-independent weight relayouts (hoist out of the per-call path)."""
    nE, d_e = E_w.shape
    rank, ni, _ = U12.shape
    assert ni * ni == d_r * d_e ** 3, "view(B, d_r, d_e, d_e, d_e) size constraint"
    fast = (ni % d_r == 0)

    uroot_s = jnp.sum(U_root, axis=-1)                                        # (nR, rank)
    u12spt = (jnp.sum(U12, axis=-1) * jnp.sum(P, axis=-1, keepdims=True)).T   # (ni, rank)
    if fast:
        m2 = ni // d_r
        u12 = u12spt.reshape(d_r, m2 * rank)      # same row-major data, r_emb-foldable
    else:
        u12 = u12spt
    u3r_b = jnp.transpose(U3R, (2, 0, 1)).astype(compute_dtype)  # (ni, rank, ni)

    # batch geometry (the module's shared einsum label requires batch == ni)
    B = ni
    tb = _pick_tb(B, max_tb)
    Bp = tb * int(pl.cdiv(B, tb))
    if Bp > B:
        u3r_b = jnp.pad(u3r_b, ((0, Bp - B), (0, 0), (0, 0)))

    # entity axis: lane-dense tiles, padded up to a multiple of the tile
    tn = int(min(max_tn, 128 * int(pl.cdiv(nE, 128))))
    nEp = tn * int(pl.cdiv(nE, tn))
    Et = E_w.T
    if nEp > nE:
        Et = jnp.pad(Et, ((0, 0), (0, nEp - nE)))
    Et = Et.astype(compute_dtype)

    return dict(uroot_s=uroot_s, u12=u12, u3r_b=u3r_b, Et=Et, fast=fast,
                d_e=d_e, d_r=d_r, rank=rank, ni=ni, nE=nE, nEp=nEp, tn=tn,
                B=B, Bp=Bp, tb=tb)


def getd_ht_pallas(E_w, R_w, U_root, U12, U3R, P, r_idx, e_idx, miss_ent_domain, *,
                   compute_dtype=jnp.bfloat16, out_dtype=jnp.bfloat16,
                   approx_recip=True, max_tb=128, max_tn=2048, prep=None):
    """Glue: gathers + one packed per-example DMA block; hot path in Pallas."""
    d_r = R_w.shape[1]
    if prep is None:  # pass a cached `prep` when the decomposition weights are static
        prep = prepare_getd_ht_weights(E_w, U_root, U12, U3R, P, d_r,
                                       compute_dtype=compute_dtype,
                                       max_tb=max_tb, max_tn=max_tn)
    d_e, rank, ni = prep['d_e'], prep['rank'], prep['ni']
    nE, nEp, tn = prep['nE'], prep['nEp'], prep['tn']
    B, Bp, tb = prep['B'], prep['Bp'], prep['tb']
    assert r_idx.shape[0] == B, "GETD_HT requires batch size == ni"

    # per-call gathers, packed into ONE lane-dense block per example
    packed = jnp.concatenate([R_w[r_idx], E_w[e_idx[0]], E_w[e_idx[1]],
                              prep['uroot_s'][r_idx]], axis=1)     # (B, d_r+2*d_e+rank)
    pk = d_r + 2 * d_e + rank
    if Bp > B:
        packed = jnp.pad(packed, ((0, Bp - B), (0, 0)))

    nb = Bp // tb
    nt = nEp // tn
    two_pass = nt > 1
    n_phase = 2 if two_pass else 1

    kernel = functools.partial(
        _getd_ht_kernel, d_e=d_e, d_r=d_r, rank=rank, ni=ni,
        miss=int(miss_ent_domain), n_valid=(nE if nEp != nE else None),
        two_pass=two_pass, fast=prep['fast'], approx_recip=approx_recip)

    # Generation-aware VMEM budget: double-buffered blocks + scratch + intermediates,
    # capped at 3/4 of physical VMEM (v7x headroom), floored at 32 MiB.
    cd = jnp.dtype(compute_dtype).itemsize
    od = jnp.dtype(out_dtype).itemsize
    est = 2 * (tb * pk * 4 + prep['u12'].size * 4 + tb * rank * ni * cd
               + d_e * tn * cd + tb * tn * od)
    est += 4 * tb * (d_e + 2)
    est += 4 * tb * (2 * (d_e ** 3) + rank * max(1, ni // d_r) + 4 * tn)
    try:
        cap = pltpu.get_tpu_info().vmem_capacity_bytes
    except Exception:
        cap = 64 * 2 ** 20
    vmem_limit = int(max(32 * 2 ** 20, min(2 * est, (3 * cap) // 4)))

    out = pl.pallas_call(
        kernel,
        out_shape=jax.ShapeDtypeStruct((Bp, nEp), out_dtype),
        grid=(nb, n_phase, nt),
        in_specs=[
            pl.BlockSpec((tb, pk), lambda i, p, j: (i, 0)),            # r_emb|e2|e3|sroot
            pl.BlockSpec(prep['u12'].shape, lambda i, p, j: (0, 0)),   # folded U12*P (resident)
            pl.BlockSpec((tb, rank, ni), lambda i, p, j: (i, 0, 0)),   # U3R batch-major (bf16)
            pl.BlockSpec((d_e, tn), lambda i, p, j: (0, j)),           # E^T entity tile
        ],
        # phase 0 parks on entity-block 0 (no writeback), phase 1 streams real tiles
        out_specs=pl.BlockSpec((tb, tn), lambda i, p, j: (i, p * j)),
        scratch_shapes=[pltpu.VMEM((tb, d_e), jnp.float32),   # vec carry
                        pltpu.VMEM((tb, 1), jnp.float32),     # running max
                        pltpu.VMEM((tb, 1), jnp.float32)],    # running sum
        compiler_params=pltpu.CompilerParams(
            dimension_semantics=("parallel", "arbitrary", "arbitrary"),
            vmem_limit_bytes=vmem_limit,
        ),
    )(packed, prep['u12'], prep['u3r_b'], prep['Et'])

    return out[:B, :nE]


def getd_ht_reference(E_w, R_w, U_root, U12, U3R, P, r_idx, e_idx, miss):
    """Pure-JAX mirror of the PyTorch forward (eval mode) for verification."""
    B = r_idx.shape[0]
    d_e = E_w.shape[1]
    d_r = R_w.shape[1]
    r_emb = R_w[r_idx] * BN_SCALE
    Uroot = U_root[r_idx]
    W = jnp.einsum('brs,ria,rjb,rkc->bijk', Uroot, U12, U3R, P[:, None, :])
    W_full = W.reshape(B, d_r, d_e, d_e, d_e)
    W_mat = jnp.einsum('bd,bdm->bm', r_emb,
                       W_full.reshape(B, d_r, -1)).reshape(B, d_e, d_e, d_e)
    e2 = E_w[e_idx[0]] * BN_SCALE
    e3 = E_w[e_idx[1]] * BN_SCALE
    if miss == 1:
        vec = jnp.einsum('bijk,bk,bj->bi', W_mat, e3, e2)
    elif miss == 2:
        vec = jnp.einsum('bijk,bk,bi->bj', W_mat, e3, e2)
    else:
        vec = jnp.einsum('bijk,bi,bj->bk', W_mat, e2, e3)
    vec = vec * BN_SCALE
    logits = vec @ E_w.T
    return jax.nn.softmax(logits, axis=1)


if __name__ == "__main__":
    # Shapes consistent with the module's constraints (ary=3, k=4): ni*ni == d_r*d_e**3, B == ni
    nE, nR = 24, 7
    d_e = d_r = 4
    rank = 8
    ni = 16
    B = ni

    key = jax.random.PRNGKey(0)
    ks = jax.random.split(key, 12)
    std = 0.5  # module uses 0.001; larger std keeps the softmax non-degenerate
    E_w = jax.random.normal(ks[0], (nE, d_e), jnp.float32) * std
    R_w = jax.random.normal(ks[1], (nR, d_r), jnp.float32) * std
    U_root = jax.random.normal(ks[2], (nR, rank, rank), jnp.float32) * std
    U12 = jax.random.normal(ks[3], (rank, ni, ni), jnp.float32) * std
    U3R = jax.random.normal(ks[4], (rank, ni, ni), jnp.float32) * std
    P = jax.random.normal(ks[5], (rank, d_e), jnp.float32) * std

    r_idx = jax.random.randint(ks[6], (B,), 0, nR)
    e2_idx = jax.random.randint(ks[7], (B,), 0, nE)
    e3_idx = jax.random.randint(ks[8], (B,), 0, nE)
    miss_ent_domain = 3

    ref = getd_ht_reference(E_w, R_w, U_root, U12, U3R, P,
                            r_idx, (e2_idx, e3_idx), miss_ent_domain)

    # 1) f32 verification path (f32 streams/output, exact reciprocal), single-pass softmax
    out32 = jax.block_until_ready(getd_ht_pallas(
        E_w, R_w, U_root, U12, U3R, P, r_idx, (e2_idx, e3_idx), miss_ent_domain,
        compute_dtype=jnp.float32, out_dtype=jnp.float32, approx_recip=False))
    assert out32.shape == (B, nE)
    np.testing.assert_allclose(np.asarray(out32), np.asarray(ref), rtol=1e-2, atol=1e-5)

    # 2) production default: bf16 streamed operands, bf16 output, EUP approx reciprocal
    out_bf = jax.block_until_ready(getd_ht_pallas(
        E_w, R_w, U_root, U12, U3R, P, r_idx, (e2_idx, e3_idx), miss_ent_domain))
    np.testing.assert_allclose(np.asarray(out_bf.astype(jnp.float32)),
                               np.asarray(ref), rtol=5e-2, atol=5e-3)

    # 3) larger entity set with a small nE tile => exercises the tiled-nE
    #    two-pass online-softmax path (+ entity padding) and another miss branch
    nE2 = 200
    E2_w = jax.random.normal(ks[9], (nE2, d_e), jnp.float32) * std
    e2b = jax.random.randint(ks[10], (B,), 0, nE2)
    e3b = jax.random.randint(ks[11], (B,), 0, nE2)
    miss_b = 1
    ref2 = getd_ht_reference(E2_w, R_w, U_root, U12, U3R, P, r_idx, (e2b, e3b), miss_b)
    out2 = jax.block_until_ready(getd_ht_pallas(
        E2_w, R_w, U_root, U12, U3R, P, r_idx, (e2b, e3b), miss_b,
        compute_dtype=jnp.float32, out_dtype=jnp.float32, approx_recip=False,
        max_tn=128))
    np.testing.assert_allclose(np.asarray(out2), np.asarray(ref2), rtol=2e-2, atol=2e-5)

    print("KERNEL_OK")
</pallas_src>

<mosaic_0001>
module attributes {stable_mosaic.version = 11 : i64} {
  func.func @_getd_ht_kernel(%arg0: i32, %arg1: i32, %arg2: i32, %arg3: memref<8x20xf32, #tpu.memory_space<vmem>>, %arg4: memref<4x32xf32, #tpu.memory_space<vmem>>, %arg5: memref<8x8x16xf32, #tpu.memory_space<vmem>>, %arg6: memref<4x128xf32, #tpu.memory_space<vmem>>, %arg7: memref<8x128xf32, #tpu.memory_space<vmem>>, %arg8: memref<8x4xf32, #tpu.memory_space<vmem>>, %arg9: memref<8x1xf32, #tpu.memory_space<vmem>>, %arg10: memref<8x1xf32, #tpu.memory_space<vmem>>) attributes {dimension_semantics = [#tpu.dimension_semantics<parallel>, #tpu.dimension_semantics<arbitrary>, #tpu.dimension_semantics<arbitrary>], iteration_bounds = array<i64: 2, 1, 1>, scalar_prefetch = 0 : i64, scratch_operands = 3 : i64, tpu.core_type = #tpu.core_type<tc>, window_params = [{transform_indices = @transform_0, window_bounds = array<i64: 8, 20>}, {pipeline_mode = #tpu.pipeline_mode<synchronous>, transform_indices = @transform_1, window_bounds = array<i64: 4, 32>}, {transform_indices = @transform_2, window_bounds = array<i64: 8, 8, 16>}, {transform_indices = @transform_3, window_bounds = array<i64: 4, 128>}, {transform_indices = @transform_4, window_bounds = array<i64: 8, 128>}]} {
    %c0_i32 = arith.constant 0 : i32
    %0 = arith.cmpi eq, %arg1, %c0_i32 : i32
    %c0_i32_0 = arith.constant 0 : i32
    %1 = arith.cmpi eq, %arg2, %c0_i32_0 : i32
    %2 = arith.andi %0, %1 : i1
    %3 = arith.extui %2 : i1 to i32
    %c0_i32_1 = arith.constant 0 : i32
    %4 = arith.cmpi ne, %3, %c0_i32_1 : i32
    scf.if %4 {
      %c0_10 = arith.constant 0 : index
      %c0_11 = arith.constant 0 : index
      %27 = vector.load %arg3[%c0_10, %c0_11] : memref<8x20xf32, #tpu.memory_space<vmem>>, vector<8x20xf32>
      %28 = vector.extract_strided_slice %27 {offsets = [0, 0], sizes = [8, 4], strides = [1, 1]} : vector<8x20xf32> to vector<8x4xf32>
      %cst_12 = arith.constant 0.999994993 : f32
      %29 = vector.broadcast %cst_12 : f32 to vector<8x4xf32>
      %30 = arith.mulf %28, %29 : vector<8x4xf32>
      %31 = vector.extract_strided_slice %27 {offsets = [0, 4], sizes = [8, 4], strides = [1, 1]} : vector<8x20xf32> to vector<8x4xf32>
      %cst_13 = arith.constant 0.999994993 : f32
      %32 = vector.broadcast %cst_13 : f32 to vector<8x4xf32>
      %33 = arith.mulf %31, %32 : vector<8x4xf32>
      %34 = vector.extract_strided_slice %27 {offsets = [0, 8], sizes = [8, 4], strides = [1, 1]} : vector<8x20xf32> to vector<8x4xf32>
      %cst_14 = arith.constant 0.999994993 : f32
      %35 = vector.broadcast %cst_14 : f32 to vector<8x4xf32>
      %36 = arith.mulf %34, %35 : vector<8x4xf32>
      %37 = vector.extract_strided_slice %27 {offsets = [0, 12], sizes = [8, 8], strides = [1, 1]} : vector<8x20xf32> to vector<8x8xf32>
      %c0_15 = arith.constant 0 : index
      %c0_16 = arith.constant 0 : index
      %c0_17 = arith.constant 0 : index
      %38 = vector.load %arg5[%c0_15, %c0_16, %c0_17] : memref<8x8x16xf32, #tpu.memory_space<vmem>>, vector<8x8x16xf32>
      %c0_18 = arith.constant 0 : index
      %c0_19 = arith.constant 0 : index
      %39 = vector.load %arg4[%c0_18, %c0_19] : memref<4x32xf32, #tpu.memory_space<vmem>>, vector<4x32xf32>
      %cst_20 = arith.constant dense<0.000000e+00> : vector<8x32xf32>
      %40 = tpu.matmul %30, %39, %cst_20 {dimension_numbers = #tpu.dot_dimension_numbers<[1], [0], [0], [1], [0, 0, 1, 1], [], []>} : vector<8x4xf32>, vector<4x32xf32>, vector<8x32xf32> -> vector<8x32xf32>
      %41 = vector.shape_cast %40 : vector<8x32xf32> to vector<8x4x8xf32>
      %42 = vector.shape_cast %37 : vector<8x8xf32> to vector<8x1x8xf32>
      %43 = vector.broadcast %42 : vector<8x1x8xf32> to vector<8x4x8xf32>
      %44 = arith.mulf %41, %43 : vector<8x4x8xf32>
      "tpu.trace_start"() <{level = 10 : i32, message = "bmr,brj->bmj"}> : () -> ()
      %cst_21 = arith.constant dense<0.000000e+00> : vector<8x4x16xf32>
      %45 = tpu.matmul %44, %38, %cst_21 {dimension_numbers = #tpu.dot_dimension_numbers<[2], [1], [1], [2], [0, 0, 0, 1, 1, 2], [0], [0]>} : vector<8x4x8xf32>, vector<8x8x16xf32>, vector<8x4x16xf32> -> vector<8x4x16xf32>
      "tpu.trace_stop"() : () -> ()
      %46 = vector.shape_cast %45 : vector<8x4x16xf32> to vector<8x4x4x4xf32>
      %47 = vector.shape_cast %36 : vector<8x4xf32> to vector<8x1x4x1xf32>
      %48 = vector.broadcast %47 : vector<8x1x4x1xf32> to vector<8x4x4x4xf32>
      %49 = arith.mulf %46, %48 : vector<8x4x4x4xf32>
      %cst_22 = arith.constant dense<0.000000e+00> : vector<8x4x4xf32>
      %50 = vector.multi_reduction <add>, %49, %cst_22 [2] : vector<8x4x4x4xf32> to vector<8x4x4xf32>
      %51 = vector.shape_cast %33 : vector<8x4xf32> to vector<8x4x1xf32>
      %52 = vector.broadcast %51 : vector<8x4x1xf32> to vector<8x4x4xf32>
      %53 = arith.mulf %50, %52 : vector<8x4x4xf32>
      %cst_23 = arith.constant dense<0.000000e+00> : vector<8x4xf32>
      %54 = vector.multi_reduction <add>, %53, %cst_23 [1] : vector<8x4x4xf32> to vector<8x4xf32>
      %cst_24 = arith.constant 0.999994993 : f32
      %55 = vector.broadcast %cst_24 : f32 to vector<8x4xf32>
      %56 = arith.mulf %54, %55 : vector<8x4xf32>
      %c0_25 = arith.constant 0 : index
      %c0_26 = arith.constant 0 : index
      %57 = vector.load %arg8[%c0_25, %c0_26] : memref<8x4xf32, #tpu.memory_space<vmem>>, vector<8x4xf32>
      tpu.vector_store %arg8[%c0_25, %c0_26], %56 {strides = array<i32>} : memref<8x4xf32, #tpu.memory_space<vmem>>, vector<8x4xf32>,
      %cst_27 = arith.constant -1.000000e+30 : f32
      %58 = vector.broadcast %cst_27 : f32 to vector<8x1xf32>
      %c0_28 = arith.constant 0 : index
      %c0_29 = arith.constant 0 : index
      %59 = vector.load %arg9[%c0_28, %c0_29] : memref<8x1xf32, #tpu.memory_space<vmem>>, vector<8x1xf32>
      tpu.vector_store %arg9[%c0_28, %c0_29], %58 {strides = array<i32>} : memref<8x1xf32, #tpu.memory_space<vmem>>, vector<8x1xf32>,
      %cst_30 = arith.constant 0.000000e+00 : f32
      %60 = vector.broadcast %cst_30 : f32 to vector<8x1xf32>
      %c0_31 = arith.constant 0 : index
      %c0_32 = arith.constant 0 : index
      %61 = vector.load %arg10[%c0_31, %c0_32] : memref<8x1xf32, #tpu.memory_space<vmem>>, vector<8x1xf32>
      tpu.vector_store %arg10[%c0_31, %c0_32], %60 {strides = array<i32>} : memref<8x1xf32, #tpu.memory_space<vmem>>, vector<8x1xf32>,
    } else {
    }
    %c0 = arith.constant 0 : index
    %c0_2 = arith.constant 0 : index
    %5 = vector.load %arg8[%c0, %c0_2] : memref<8x4xf32, #tpu.memory_space<vmem>>, vector<8x4xf32>
    %c0_3 = arith.constant 0 : index
    %c0_4 = arith.constant 0 : index
    %6 = vector.load %arg6[%c0_3, %c0_4] : memref<4x128xf32, #tpu.memory_space<vmem>>, vector<4x128xf32>
    %cst = arith.constant dense<0.000000e+00> : vector<8x128xf32>
    %7 = tpu.matmul %5, %6, %cst {dimension_numbers = #tpu.dot_dimension_numbers<[1], [0], [0], [1], [0, 0, 1, 1], [], []>} : vector<8x4xf32>, vector<4x128xf32>, vector<8x128xf32> -> vector<8x128xf32>
    %c128_i32 = arith.constant 128 : i32
    %8 = arith.muli %arg2, %c128_i32 : i32
    %9 = tpu.iota {dimensions = array<i32: 1>} : vector<8x128xi32>
    %10 = vector.broadcast %8 : i32 to vector<8x128xi32>
    %11 = arith.addi %10, %9 : vector<8x128xi32>
    %c24_i32 = arith.constant 24 : i32
    %12 = vector.broadcast %c24_i32 : i32 to vector<8x128xi32>
    %13 = arith.cmpi slt, %11, %12 : vector<8x128xi32>
    %cst_5 = arith.constant -1.000000e+30 : f32
    %14 = vector.broadcast %cst_5 : f32 to vector<8x128xf32>
    %15 = arith.select %13, %7, %14 : vector<8x128xi1>, vector<8x128xf32>
    %cst_6 = arith.constant dense<0xFF800000> : vector<8xf32>
    %16 = vector.multi_reduction <maximumf>, %15, %cst_6 [1] : vector<8x128xf32> to vector<8xf32>
    %17 = vector.shape_cast %16 : vector<8xf32> to vector<8x1xf32>
    %18 = vector.broadcast %17 : vector<8x1xf32> to vector<8x128xf32>
    %19 = arith.subf %15, %18 : vector<8x128xf32>
    %20 = math.exp %19 : vector<8x128xf32>
    %cst_7 = arith.constant dense<0.000000e+00> : vector<8xf32>
    %21 = vector.multi_reduction <add>, %20, %cst_7 [1] : vector<8x128xf32> to vector<8xf32>
    %22 = vector.shape_cast %21 : vector<8xf32> to vector<8x1xf32>
    %23 = tpu.reciprocal %22 : vector<8x1xf32> -> vector<8x1xf32>
    %24 = vector.broadcast %23 : vector<8x1xf32> to vector<8x128xf32>
    %25 = arith.mulf %20, %24 : vector<8x128xf32>
    %c0_8 = arith.constant 0 : index
    %c0_9 = arith.constant 0 : index
    %26 = vector.load %arg7[%c0_8, %c0_9] : memref<8x128xf32, #tpu.memory_space<vmem>>, vector<8x128xf32>
    tpu.vector_store %arg7[%c0_8, %c0_9], %25 {strides = array<i32>} : memref<8x128xf32, #tpu.memory_space<vmem>>, vector<8x128xf32>,
    return
  }
  func.func @transform_0(%arg0: i32, %arg1: i32, %arg2: i32) -> (i32, i32) {
    %c0_i32 = arith.constant 0 : i32
    %c0_i32_0 = arith.constant 0 : i32
    return %arg0, %c0_i32 : i32, i32
  }
  func.func @transform_1(%arg0: i32, %arg1: i32, %arg2: i32) -> (i32, i32) {
    %c0_i32 = arith.constant 0 : i32
    %c0_i32_0 = arith.constant 0 : i32
    %c0_i32_1 = arith.constant 0 : i32
    return %c0_i32, %c0_i32_0 : i32, i32
  }
  func.func @transform_2(%arg0: i32, %arg1: i32, %arg2: i32) -> (i32, i32, i32) {
    %c0_i32 = arith.constant 0 : i32
    %c0_i32_0 = arith.constant 0 : i32
    %c0_i32_1 = arith.constant 0 : i32
    return %arg0, %c0_i32, %c0_i32_0 : i32, i32, i32
  }
  func.func @transform_3(%arg0: i32, %arg1: i32, %arg2: i32) -> (i32, i32) {
    %c0_i32 = arith.constant 0 : i32
    %c0_i32_0 = arith.constant 0 : i32
    return %c0_i32, %arg2 : i32, i32
  }
  func.func @transform_4(%arg0: i32, %arg1: i32, %arg2: i32) -> (i32, i32) {
    %0 = arith.muli %arg1, %arg2 : i32
    %c0_i32 = arith.constant 0 : i32
    return %arg0, %0 : i32, i32
  }
}

</mosaic_0001>

<bundles_post_ra>
// kernel: tpu_custom_call.1
= control target key start
LH: loop header
LB: loop body
LE: loop exit
PB: predicated region body
PF: predicated region fallthrough
CT: control target
= control target key end

     0   :  { %9 = vsyncpa [#allocation6], 0  ;;  %s3592_s0 = inlined_call_operand.hbm [shape: f32[16,20], index: 0, kind: input, shape index: {}]   ;;  %s3593_s1 = inlined_call_operand.hbm [shape: f32[4,32], index: 1, kind: input, shape index: {}]   ;;  %s3594_s2 = inlined_call_operand.hbm [shape: f32[16,8,16], index: 2, kind: input, shape index: {}]   ;;  %s3595_s3 = inlined_call_operand.vmem [shape: f32[4,128], index: 3, kind: input, shape index: {}]   ;;  %s3596_s4 = inlined_call_operand.hbm [shape: f32[16,128], index: 4, kind: output, shape index: {}]  }
   0x1   :  { %11 = vsyncpa [#allocation6 + $0x1], 0 }
   0x2   :  { %12 = vsyncpa [#allocation9], 0 }
   0x3   :  { %13 = vsyncpa [#allocation7], 0 }
   0x4   :  { %15 = vsyncpa [#allocation7 + $0x1], 0  ;;  %s2824_s15 = smov 0   ;;  %s2826_s16 = smov 0  }
   0x5   :  { %s2828_s17 = smov 0   ;;  %s2830_s18 = smov 0  }
   0x6   :  { %s2832_s19 = smov 0   ;;  %s2834_s20 = smov 0  }
   0x7 LB: > { %s40_s21 = sadd.s32 1, %s2777_s19  ;;  %s47_s22 = sadd.s32 1, %s2769_s17  ;;  %s2781_s20 = sphi %s2834_s20, %s21_s20   ;;  %s2777_s19 = sphi %s2832_s19, %s3620_s19   ;;  %s2773_s18 = sphi %s2830_s18, %s3619_s18   ;;  %s2769_s17 = sphi %s2828_s17, %s3618_s17   ;;  %s2765_s16 = sphi %s2826_s16, %s3617_s16   ;;  %s2761_s15 = sphi %s2824_s15, %s3616_s15  }
   0x8   : > { %p42_p0 = scmp.ge.s32.totalorder %s40_s21, 2  ;;  %p54_p1 = scmp.ne.s32.totalorder %s2769_s17, %s2765_s16 }
   0x9   : > { %p55_p2 = scmp.eq.s32.totalorder %s2781_s20, 0  ;;  %p2533_p5 = scmp.lt.s32.totalorder %s2781_s20, 2 }
   0xa   : > { %s3622_s21 = smov (%p42_p0, %s40_s21), 0  ;;  %s205_s24 = sand.u32 1, %s2781_s20  }
   0xb   : > { %p56_p4 = por %p55_p2, %p54_p1  ;;  %s44_s23 = ssub.s32 %s2777_s19, %s3622_s21 }
   0xc   : > { %p45_p6 = scmp.eq.s32.totalorder %s44_s23, 0  ;;  %s207_s25 = sand.u32 1, %s2769_s17  }
   0xd   : > { %s2411_s26 = sshll.u32 %s2777_s19, 7  ;;  %s2410_s28 = sshll.u32 %s207_s25, 3 }
   0xe   : > { %s2872_s27 = scalar_select %p45_p6, %s2769_s17, %s47_s22  }
   0xf   : > { %s2877_s5 = scalar_lea.hbm %s3592_s0, %s2411_s26  ;;  %p2879_p7 = pnand %p2533_p5, %p56_p4 }
  0x10   : > { %s209_s7 = scalar_lea.vmem [#allocation5], %s2410_s28  ;;  %s2883_s9 = sshll.u32 %s207_s25, 6 }
  0x11   : > { %s216_s8 = sshll.u32 %s209_s7, 4  ;;  %s2887_s10 = scalar_lea.sflag [#allocation6], %s205_s24  ;;  %s2885_s8 = int_to_ptr.vmem [resolvable:$true] %s216_s8 }
  0x12   : > { %s2603_s11 = scalar_lea.hbm %s2877_s5, 128  ;;  %p2605_p9 = pneg %p2879_p7 }
  0x13   : > { %p2604_p8 = scmp.ne.s32.totalorder %s2877_s5, %s2603_s11  ;;  %s2608_s14 = scalar_lea.hbm %s3592_s0, 256 }
  0x14   : > { %p2609_p12 = scmp.lt.u32.totalorder %s2877_s5, %s3592_s0  ;;  %p2610_p13 = scmp.lt.u32.totalorder %s2608_s14, %s2603_s11 }
  0x15   : > { %p2606_p10 = pnand %p2605_p9, %p2604_p8  ;;  %p2612_p2 = scmp.lt.u32.totalorder %s2603_s11, %s2877_s5 }
  0x16   : > { %p2611_p0 = por %p2610_p13, %p2609_p12 }
  0x17   : > { %p2607_p11 = pneg %p2606_p10 }
  0x18   : > { %p2613_p4 = por %p2612_p2, %p2611_p0 }
  0x1a   : > { %p2614_p5 = pnand %p2613_p4, %p2607_p11 }
  0x1c   : > { %2617 = shalt.err (!%p2614_p5)
}
  0x1d   : > { %s2618_s24 = scalar_lea.vmem %s2885_s8, 128  ;;  %s2783_s25 = smov [#allocation5]  }
  0x1e   : > { %p2619_p6 = scmp.ne.s32.totalorder %s2885_s8, %s2618_s24  ;;  %s2623_s26 = sshll.u32 %s2783_s25, 4  ;;  %s2624_s26 = int_to_ptr.vmem [resolvable:$false] %s2623_s26 }
  0x1f   : > { %s2625_s28 = scalar_lea.vmem %s2624_s26, 256  ;;  %p2626_p3 = scmp.lt.s32.totalorder %s2885_s8, %s2624_s26 }
  0x20   : > { %p2621_p8 = pnand %p2619_p6, %p2605_p9  ;;  %p2627_p12 = scmp.lt.s32.totalorder %s2625_s28, %s2618_s24 }
  0x22   : > { %p2622_p10 = pneg %p2621_p8  ;;  %p2628_p13 = por %p2627_p12, %p2626_p3 }
  0x24   : > { %p2629_p0 = pnand %p2628_p13, %p2622_p10 }
  0x26   : > { %2632 = shalt.err (!%p2629_p0)
}
  0x27   : > { %2524 = dma.hbm_to_vmem [thread:$0]  (!%p2879_p7), %s2877_s5, 128, %s2885_s8, %s2887_s10  }
  0x28   : > { %s2436_s29 = sshll.u32 %s2777_s19, 10  ;;  %s227_s30 = scalar_lea.vmem [#allocation10], %s2883_s9 }
  0x29   : > { %s234_s7 = sshll.u32 %s227_s30, 4  ;;  %s2918_s11 = sadd.s32 4294967295, %s2781_s20   ;;  %s2944_s7 = int_to_ptr.vmem [resolvable:$true] %s234_s7 }
  0x2a   : > { %s2405_s12 = sadd.s32 4294967294, %s2781_s20   ;;  %p60_p3 = scmp.ne.s32.totalorder %s2765_s16, %s2761_s15 }
  0x2b   : > { %p3597_p11 = scmp.eq.s32.totalorder %s2918_s11, 0  ;;  %p161_p2 = scmp.eq.s32.totalorder %s2918_s11, 1 }
  0x2c   : > { %p167_p4 = scmp.eq.s32.totalorder %s2405_s12, 1  ;;  %p2406_p6 = scmp.ge.s32.totalorder %s2781_s20, 1 }
  0x2d   : > { %p2927_p5 = por %p3597_p11, %p60_p3  ;;  %p2935_p8 = por %p161_p2, %p54_p1 }
  0x2e   : > { %p2939_p10 = por %p167_p4, %p60_p3  ;;  %p174_p12 = scmp.lt.s32.totalorder %s2781_s20, 3 }
  0x2f   : > { %s3602_s13 = scalar_select %p2927_p5, 1, 0 }
  0x30   : > { %s3603_s5 = scalar_select %p2935_p8, 1, 0 }
  0x31   : > { %s3604_s8 = scalar_select %p2939_p10, 1, 0 }
  0x32   : > { %p2946_p13 = pnand %p2406_p6, %p174_p12  ;;  %s2953_s23 = scalar_lea.hbm %s3594_s2, %s2436_s29 }
  0x33   : > { %s2784_s24 = smov [#allocation8]   ;;  %s2633_s26 = scalar_lea.hbm %s2953_s23, 1024 }
  0x34   : > { %s3605_s9 = scalar_select %p2946_p13, 1, 0 }
  0x35   : > { %s2955_s25 = sshll.u32 %s2784_s24, 4  ;;  %p2634_p0 = scmp.ne.s32.totalorder %s2953_s23, %s2633_s26  ;;  %s188_s25 = int_to_ptr.vmem [resolvable:$true] %s2955_s25 }
  0x36   : > { %s2638_s29 = scalar_lea.hbm %s3594_s2, 2048  ;;  %p2639_p4 = scmp.lt.u32.totalorder %s2953_s23, %s3594_s2 }
  0x37   : > { %p2636_p3 = pnand %p2634_p0, %p2605_p9  ;;  %p2640_p6 = scmp.lt.u32.totalorder %s2638_s29, %s2633_s26 }
  0x38   : > { %p2642_p11 = scmp.lt.u32.totalorder %s2633_s26, %s2953_s23 }
  0x39   : > { %p2637_p2 = pneg %p2636_p3  ;;  %p2641_p12 = por %p2640_p6, %p2639_p4 }
  0x3b   : > { %p2643_p10 = por %p2642_p11, %p2641_p12 }
  0x3d   : > { %p2644_p8 = pnand %p2643_p10, %p2637_p2 }
  0x3f   : > { %2647 = shalt.err (!%p2644_p8)
}
  0x40   : > { %s2648_s22 = scalar_lea.vmem %s2944_s7, 1024  ;;  %s2785_s24 = smov [#allocation10]  }
  0x41   : > { %p2649_p0 = scmp.ne.s32.totalorder %s2944_s7, %s2648_s22  ;;  %s2653_s28 = sshll.u32 %s2785_s24, 4  ;;  %s2654_s28 = int_to_ptr.vmem [resolvable:$false] %s2653_s28 }
  0x42   : > { %s2655_s30 = scalar_lea.vmem %s2654_s28, 2048  ;;  %p2656_p5 = scmp.lt.s32.totalorder %s2944_s7, %s2654_s28 }
  0x43   : > { %p2651_p3 = pnand %p2649_p0, %p2605_p9  ;;  %p2657_p4 = scmp.lt.s32.totalorder %s2655_s30, %s2648_s22 }
  0x45   : > { %p2652_p1 = pneg %p2651_p3  ;;  %p2658_p6 = por %p2657_p4, %p2656_p5 }
  0x47   : > { %p2659_p11 = pnand %p2658_p6, %p2652_p1 }
  0x49   : > { %2662 = shalt.err (!%p2659_p11)
}
  0x4a   : > { %s2786_s26 = smov 128   ;;  %s2787_s29 = smov 8  }
  0x4b   : > { %2527 = dma.hbm_to_vmem [thread:$0]  (!%p2879_p7), %s2953_s23, 1024, %s2944_s7, %s2887_s10, %s2786_s26, %s2786_s26, %s2787_s29  }
  0x4c   : > { %p3606_p9 = scmp.eq.s32.totalorder %s2918_s11, 0  ;;  %p3607_p8 = pneg %p2946_p13 }
  0x4d   : > { %s2663_s24 = scalar_lea.hbm %s3593_s1, 64 }
  0x4e   : > { %p2989_p10 = pnand %p3607_p8, %p3606_p9  ;;  %p2664_p5 = scmp.ne.s32.totalorder %s3593_s1, %s2663_s24 }
  0x4f   : > { %p2670_p12 = scmp.lt.u32.totalorder %s2663_s24, %s3593_s1 }
  0x50   : > { %p2665_p1 = pneg %p2989_p10 }
  0x52   : > { %p2666_p7 = pnand %p2665_p1, %p2664_p5 }
  0x54   : > { %p2667_p2 = pneg %p2666_p7 }
  0x56   : > { %p2672_p0 = pnand %p2670_p12, %p2667_p2 }
  0x58   : > { %2675 = shalt.err (!%p2672_p0)
}
  0x59   : > { %s2676_s7 = scalar_lea.vmem %s188_s25, 64  ;;  %p2684_p11 = scmp.lt.s32.totalorder %s188_s25, %s188_s25 }
  0x5a   : > { %p2677_p3 = scmp.ne.s32.totalorder %s188_s25, %s2676_s7  ;;  %p2685_p9 = scmp.lt.s32.totalorder %s2676_s7, %s2676_s7 }
  0x5c   : > { %p2679_p4 = pnand %p2677_p3, %p2665_p1  ;;  %p2686_p8 = por %p2685_p9, %p2684_p11 }
  0x5e   : > { %p2680_p6 = pneg %p2679_p4 }
  0x60   : > { %p2687_p13 = pnand %p2686_p8, %p2680_p6 }
  0x62   : > { %2690 = shalt.err (!%p2687_p13)
}
  0x63   : > { %2520 = dma.hbm_to_vmem [thread:$0]  (!%p2989_p10), %s3593_s1, 64, %s188_s25, [#allocation9]  }
  0x64   : > { %p3609_p5 = scmp.ne.s32.totalorder %s3605_s9, 0 }
  0x65   : > { %s248_s29 = sand.u32 (!%p3609_p5), 1, %s2918_s11   ;;  %s3013_s14 = sand.u32 (!%p3609_p5), 1, %s2765_s16  }
  0x66   : > { %246 = sbr.rel (%p3609_p5) target bundleno = 1495 (0x5d7), region = 36  ;;  %s2416_s22 = sshll.u32 (!%p3609_p5), %s3013_s14, 3 }
  0x67   : > { %s249_s24 = scalar_lea.sflag (!%p3609_p5), [#allocation6], %s248_s29  ;;  %s252_s28 = scalar_lea.vmem (!%p3609_p5), [#allocation5], %s2416_s22 }
  0x68   : > { %p3610_p13 = scmp.ne.s32.totalorder (!%p3609_p5), %s3602_s13, 0 }
  0x6d   : > { %2744 = dma.done.wait (%p3610_p13), %s249_s24, 128  }
  0x6e   : > { %2746 = vsyncadd (%p3610_p13), %s249_s24, 4294967168  ;;  %p3611_p10 = scmp.eq.s32.totalorder %s2918_s11, 0 }
  0x70   : > { %2748 = dma.done.wait (%p3611_p10), [#allocation9], 64   ;;  %p3612_p1 = pmov %p3611_p10 }
  0x71   : > { %s2418_s9 = sshll.u32 %s3013_s14, 6 }
  0x72   : > { %2750 = vsyncadd (%p3612_p1), [#allocation9], 4294967232  ;;  %s3027_s25 = scalar_lea.vmem [#allocation10], %s2418_s9 }
  0x73   : > { %2752 = dma.done.wait (%p3610_p13), %s249_s24, 1024  }
  0x74   : > { %2754 = vsyncadd (%p3610_p13), %s249_s24, 4294966272  ;;  %v2788_v0 = vmov 0.0   ;;  %vm2789_vm0 = vmmov 0   ;;  %vm326_vm1 = vcmask 1043456   ;;  %v321_v1 = vld [vmem:[#allocation8] sm:$0xf]  ;;  %v415_v4 = vlaneseq }
  0x75   : > { %2457 = vmatprep.subr.mxu0 %v2788_v0  ;;  %2462 = vmatprep.subr.mxu1 %v2788_v0  ;;  %v311_v2 = vld [vmem:[%s252_s28] sm:$0xff]  ;;  %vm322_vm2 = vcmask 31744   ;;  %v2790_v5 = vmov 1966171168   ;;  %s2791_s11 = smov 104   ;;  %s2792_s13 = smov 120  }
  0x76   : > { %2459 = vmatprep.mubr.msk.f32.mxu0 %vm2789_vm0, %v2788_v0  ;;  %2464 = vmatprep.mubr.msk.f32.mxu1 %vm2789_vm0, %v2788_v0  ;;  %v3040_v3 = vmul.f32 0.999995, %v311_v2  ;;  %v481_v6 = vunpack.c.l.s4 %v2790_v5  ;;  %v3048_v7 = vshrl.u32 %v415_v4, 7  ;;  %v479_v11 = vcombine.high %v311_v2, %v311_v2  ;;  %v313_v21 = vld [vmem:[%s3027_s25] sm:$0xff]  ;;  %v314_v22 = vld [vmem:[%s3027_s25 + $0x8] sm:$0xff]  ;;  %s2793_s12 = smov 116  }
  0x77   : > { %2458 = vmatpush3.msk.msra.mxu0 %vm326_vm1, %v321_v1  ;;  %2463 = vmatpush3.msra.mxu1 %v313_v21  ;;  %s2794_s30 = smov 112   ;;  %v2795_v43 = vmov 1983009808   ;;  %v2796_v46 = vmov 1934713408   ;;  %vm592_vm3 = vcmask 64512  }
  0x78   : > { %2467 = vmatprep.subr.mxu0 %v2788_v0  ;;  %2460 = vmatmul.mubr.msk.f32.vlgmr.msra.gmra.mrb[0].mxu0 %vm322_vm2, %v3040_v3  ;;  %v482_v8 = vunpack.c.0.s8 %v481_v6  ;;  %v530_v13 = vsub.s32 0, %v3048_v7  ;;  %v1539_v35 = vsub.s32 1, %v3048_v7  ;;  %v1547_v37 = vsub.s32 2, %v3048_v7  ;;  %v317_v21 = vld [vmem:[%s3027_s25 + $0x20] sm:$0xff]  ;;  %s2797_s6 = smov 124   ;;  %s2433_s23 = sshll.u32 %s2773_s18, 7 }
  0x79   : > { %2469 = vmatprep.mubr.msk.f32.mxu0 %vm2789_vm0, %v2788_v0  ;;  %2472 = vmatprep.subr.mxu1 %v2788_v0  ;;  %v1555_v41 = vsub.s32 3, %v3048_v7  ;;  %v413_v44 = vunpack.c.l.s4 %v2795_v43  ;;  %v445_v47 = vunpack.c.l.s4 %v2796_v46  ;;  %vm1625_vm4 = vcmask 27648   ;;  %s298_s26 = scalar_lea.vmem [#allocation11], %s2416_s22  ;;  %s3543_s9 = scalar_lea.hbm %s3596_s4, %s2433_s23 }
  0x7a   : > { %v485_v9 = vsub.s32 %v482_v8, %v3048_v7  ;;  %2468 = vmatpush3.msra.mxu0 %v314_v22  ;;  %v3072_v38 = vrot.slane %v3040_v3, %v1539_v35  ;;  %v3077_v39 = vrot.slane %v3040_v3, %v1547_v37  ;;  %v3080_v40 = vrot.slane %v3040_v3, %v530_v13  ;;  %s2277_s29 = sshll.u32 %s298_s26, 4  ;;  %p3613_p2 = scmp.ne.s32.totalorder %s3603_s5, 0  ;;  %s3545_s29 = int_to_ptr.vmem [resolvable:$true] %s2277_s29 }
  0x7b   : > { %2477 = vmatprep.subr.mxu0 %v2788_v0  ;;  %v3086_v42 = vrot.slane %v3040_v3, %v1555_v41  ;;  %v414_v45 = vunpack.c.0.s8 %v413_v44  ;;  %v446_v51 = vunpack.c.0.s8 %v445_v47  ;;  %vm2011_vm5 = vcmask 1041409   ;;  %s2798_s18 = smov [#allocation11]  }
  0x7c   : > { %v486_v10 = vrot.slane %v311_v2, %v485_v9  ;;  %v493_v17 = vrot.slane %v479_v11, %v485_v9  ;;  %vm2014_vm6 = vcmask 1042434   ;;  %vm2017_vm7 = vcmask 1043459   ;;  %s2695_s22 = sshll.u32 %s2798_s18, 4  ;;  %s2696_s22 = int_to_ptr.vmem [resolvable:$false] %s2695_s22 }
  0x7d   : > { %v3090_v50 = vsub.s32 %v414_v45, %v3048_v7  ;;  %v3095_v57 = vsub.s32 %v446_v51, %v3048_v7  ;;  %vm2148_vm8 = vcmask 1044484   ;;  %vm2151_vm9 = vcmask 1045509   ;;  %p2698_p3 = scmp.lt.s32.totalorder %s3545_s29, %s2696_s22 }
  0x7e   : > { %v502_v12 = vrot.slane %v486_v10, %v485_v9  ;;  %v494_v14 = vcombine.high %v486_v10, %v486_v10  ;;  %v509_v24 = vrot.slane %v493_v17, %v485_v9  ;;  %v495_v27 = vcombine.high %v493_v17, %v493_v17 }
  0x7f   : > { %vm2154_vm10 = vcmask 1046534   ;;  %vm2157_vm11 = vcmask 1047559  }
  0x80   : > { %v524_v16 = vcombine.high %v502_v12, %v502_v12  ;;  %v531_v19 = vrot.slane %v502_v12, %v530_v13  ;;  %v516_v20 = vrot.slane %v494_v14, %v485_v9  ;;  %v547_v28 = vrot.slane %v509_v24, %v530_v13 }
  0x81   : > { %v525_v30 = vcombine.high %v509_v24, %v509_v24  ;;  %v523_v31 = vrot.slane %v495_v27, %v485_v9  ;;  %v318_v24 = vld [vmem:[%s3027_s25 + $0x28] sm:$0xff] }
  0x82   : > { %v539_v23 = vrot.slane %v524_v16, %v530_v13  ;;  %v535_v25 = vrot.slane %v516_v20, %v530_v13  ;;  %v526_v26 = vcombine.high %v516_v20, %v516_v20  ;;  %v316_v16 = vld [vmem:[%s3027_s25 + $0x18] sm:$0xff] }
  0x83   : > { %v555_v32 = vrot.slane %v525_v30, %v530_v13  ;;  %v551_v33 = vrot.slane %v523_v31, %v530_v13  ;;  %v527_v34 = vcombine.high %v523_v31, %v523_v31  ;;  %v320_v31 = vld [vmem:[%s3027_s25 + $0x38] sm:$0xff] }
  0x84   : > { %v543_v29 = vrot.slane %v526_v26, %v530_v13 }
  0x85   : > { %v559_v36 = vrot.slane %v527_v34, %v530_v13  ;;  %v315_v13 = vld [vmem:[%s3027_s25 + $0x10] sm:$0xff] }
 0x14b   : > { %v3052_v15 = vpop.f32.mrb[0].mxu0 }
 0x14c   : > { %407 = vrot.lane.b32.xlu1 %v3052_v15, %s2791_s11  ;;  %401 = vrot.lane.b32.xlu0 %v3052_v15, %s2792_s13  ;;  %v2461_v18 = vpop.f32.mrb[1].mxu0  ;;  %s2691_s11 = scalar_lea.vmem %s3545_s29, 128 }
 0x14d   : > { %p2692_p7 = scmp.ne.s32.totalorder %s3545_s29, %s2691_s11 }
 0x14f   : > { %p2693_p12 = pnand %p2692_p7, %p3613_p2 }
 0x150   : > { %560 = vrot.lane.b32.xlu1 %v531_v19, %s2793_s12  ;;  %404 = vrot.lane.b32.xlu0 %v3052_v15, %s2794_s30 }
 0x151   : > { %p2694_p0 = pneg %p2693_p12 }
 0x154   : > { %564 = vrot.lane.b32.xlu1 %v539_v23, %s2793_s12  ;;  %562 = vrot.lane.b32.xlu0 %v535_v25, %s2793_s12 }
 0x158   : > { %568 = vrot.lane.b32.xlu1 %v547_v28, %s2793_s12  ;;  %566 = vrot.lane.b32.xlu0 %v543_v29, %s2793_s12  ;;  %v319_v28 = vld [vmem:[%s3027_s25 + $0x30] sm:$0xff]  ;;  %s2262_s25 = scalar_lea.sflag [#allocation7], %s3013_s14 }
 0x15c   : > { %572 = vrot.lane.b32.xlu1 %v555_v32, %s2793_s12  ;;  %570 = vrot.lane.b32.xlu0 %v551_v33, %s2793_s12 }
 0x160   : > { %574 = vrot.lane.b32.xlu0 %v559_v36, %s2793_s12  ;;  %1543 = vbcast.lane.b32.xlu1 %v3072_v38, 264 }
 0x164   : > { %1551 = vbcast.lane.b32.xlu0 %v3077_v39, 264  ;;  %1535 = vbcast.lane.b32.xlu1 %v3080_v40, 264 }
 0x168   : > { %1559 = vbcast.lane.b32.xlu0 %v3086_v42, 264 }
 0x1be   : > { %v408_v48 = vpop.permute.xlu1 %407  ;;  %v402_v49 = vpop.permute.xlu0 %401 }
 0x1bf   : > { %v426_v52 = vcombine.low %v402_v49, %v408_v48  ;;  %v427_v58 = vcombine.high %v402_v49, %v408_v48 }
 0x1c1   : > { %v434_v59 = vrot.slane %v426_v52, %v3090_v50  ;;  %v441_v5 = vrot.slane %v427_v58, %v3090_v50  ;;  %v1563_v58 = vsub.s32 4, %v3048_v7 }
 0x1c2   : > { %v561_v53 = vpop.permute.xlu1 %560  ;;  %v405_v54 = vpop.permute.xlu0 %404 }
 0x1c3   : > { %v410_v55 = vcombine.low %v3052_v15, %v405_v54  ;;  %v411_v56 = vcombine.high %v3052_v15, %v405_v54 }
 0x1c5   : > { %v418_v60 = vrot.slane %v410_v55, %v3090_v50  ;;  %v425_v62 = vrot.slane %v411_v56, %v3090_v50 }
 0x1c6   : > { %v563_v61 = vpop.permute.xlu0 %562  ;;  %v565_v2 = vpop.permute.xlu1 %564 }
 0x1c7   : > { %v442_v63 = vcombine.low %v418_v60, %v434_v59  ;;  %v443_v1 = vcombine.high %v418_v60, %v434_v59  ;;  %v458_v12 = vcombine.low %v425_v62, %v441_v5  ;;  %v459_v20 = vcombine.high %v425_v62, %v441_v5 }
 0x1c8   : > { %v1571_v59 = vsub.s32 5, %v3048_v7  ;;  %v1564_v60 = vrot.slane %v3040_v3, %v1563_v58 }
 0x1c9   : > { %v457_v6 = vrot.slane %v443_v1, %v3095_v57  ;;  %v450_v8 = vrot.slane %v442_v63, %v3095_v57  ;;  %v466_v19 = vrot.slane %v458_v12, %v3095_v57  ;;  %v473_v26 = vrot.slane %v459_v20, %v3095_v57 }
 0x1ca   : > { %v567_v9 = vpop.permute.xlu0 %566  ;;  %v569_v17 = vpop.permute.xlu1 %568  ;;  %v1572_v62 = vrot.slane %v3040_v3, %v1571_v59  ;;  %v1587_v63 = vsub.s32 7, %v3048_v7 }
 0x1cb   : > { %v474_v10 = vcombine.high %v450_v8, %v2788_v0  ;;  %v584_v11 = vmul.f32 %v561_v53, %v450_v8  ;;  %v475_v15 = vcombine.high %v457_v6, %v2788_v0  ;;  %v586_v18 = vmul.f32 %v565_v2, %v457_v6 }
 0x1cc   : > { %v588_v25 = vmul.f32 %v569_v17, %v466_v19  ;;  %v476_v27 = vcombine.high %v466_v19, %v2788_v0  ;;  %v477_v34 = vcombine.high %v473_v26, %v2788_v0  ;;  %v1588_v2 = vrot.slane %v3040_v3, %v1587_v63 }
 0x1cd   : > { %v585_v14 = vmul.f32 %v563_v61, %v474_v10  ;;  %2465 = vmatmul.mubr.msk.f32.vlgmr.msra.gmra.mrb[0].mxu1 %vm592_vm3, %v584_v11  ;;  %v587_v23 = vmul.f32 %v567_v9, %v475_v15  ;;  %v1579_v61 = vsub.s32 6, %v3048_v7 }
 0x1ce   : > { %2473 = vmatpush3.msra.mxu1 %v315_v13  ;;  %2474 = vmatprep.mubr.msk.f32.mxu1 %vm2789_vm0, %v2788_v0  ;;  %v571_v22 = vpop.permute.xlu0 %570  ;;  %v573_v29 = vpop.permute.xlu1 %572 }
 0x1cf   : > { %2470 = vmatmul.mubr.msk.f32.vlgmr.msra.gmra.mrb[2].mxu0 %vm592_vm3, %v585_v14  ;;  %2482 = vmatprep.subr.mxu1 %v2788_v0  ;;  %v589_v30 = vmul.f32 %v571_v22, %v476_v27  ;;  %v590_v33 = vmul.f32 %v573_v29, %v473_v26  ;;  %v1580_v1 = vrot.slane %v3040_v3, %v1579_v61 }
 0x1d0   : > { %2478 = vmatpush3.msra.mxu0 %v316_v16  ;;  %2479 = vmatprep.mubr.msk.f32.mxu0 %vm2789_vm0, %v2788_v0 }
 0x1d1   : > { %2475 = vmatmul.mubr.msk.f32.vlgmr.msra.gmra.mrb[2].mxu1 %vm592_vm3, %v586_v18  ;;  %2487 = vmatprep.subr.mxu0 %v2788_v0 }
 0x1d2   : > { %2483 = vmatpush3.msra.mxu1 %v317_v21  ;;  %2484 = vmatprep.mubr.msk.f32.mxu1 %vm2789_vm0, %v2788_v0  ;;  %v575_v32 = vpop.permute.xlu0 %574  ;;  %v3218_v7 = vpop.permute.xlu1 %1543 }
 0x1d3   : > { %2480 = vmatmul.mubr.msk.f32.vlgmr.msra.gmra.mrb[4].mxu0 %vm592_vm3, %v587_v23  ;;  %2492 = vmatprep.subr.mxu1 %v2788_v0  ;;  %v591_v35 = vmul.f32 %v575_v32, %v477_v34 }
 0x1d4   : > { %2488 = vmatpush3.msra.mxu0 %v318_v24  ;;  %2489 = vmatprep.mubr.msk.f32.mxu0 %vm2789_vm0, %v2788_v0 }
 0x1d5   : > { %2485 = vmatmul.mubr.msk.f32.vlgmr.msra.gmra.mrb[4].mxu1 %vm592_vm3, %v588_v25  ;;  %2497 = vmatprep.subr.mxu0 %v2788_v0 }
 0x1d6   : > { %2493 = vmatpush3.msra.mxu1 %v319_v28  ;;  %2494 = vmatprep.mubr.msk.f32.mxu1 %vm2789_vm0, %v2788_v0  ;;  %v3220_v5 = vpop.permute.xlu0 %1551  ;;  %v1536_v6 = vpop.permute.xlu1 %1535 }
 0x1d7   : > { %2490 = vmatmul.mubr.msk.f32.vlgmr.msra.gmra.mrb[6].mxu0 %vm592_vm3, %v589_v30  ;;  %2502 = vmatprep.subr.mxu1 %v2788_v0 }
 0x1d8   : > { %2498 = vmatpush3.msra.mxu0 %v320_v31  ;;  %2499 = vmatprep.mubr.msk.f32.mxu0 %vm2789_vm0, %v2788_v0 }
 0x1d9   : > { %2495 = vmatmul.mubr.msk.f32.vlgmr.msra.gmra.mrb[6].mxu1 %vm592_vm3, %v590_v33 }
 0x1da   : > { %2504 = vmatprep.mubr.msk.f32.mxu1 %vm2789_vm0, %v2788_v0  ;;  %v3222_v3 = vpop.permute.xlu0 %1559 }
 0x1db   : > { %2500 = vmatmul.mubr.msk.f32.vlgmr.msra.gmra.mrb[8].mxu0 %vm592_vm3, %v591_v35 }
 0x2a0   : > { %v3142_v36 = vpop.f32.mrb[0].mxu1 }
 0x2a1   : > { %1185 = vrot.lane.b32.xlu1 %v3142_v36, %s2797_s6  ;;  %v2466_v37 = vpop.f32.mrb[1].mxu1 }
 0x2a2   : > { %v3146_v41 = vpop.f32.mrb[2].mxu0 }
 0x2a3   : > { %1211 = vrot.lane.b32.xlu0 %v3146_v41, %s2792_s13  ;;  %v2471_v43 = vpop.f32.mrb[3].mxu0 }
 0x2a4   : > { %v3150_v44 = vpop.f32.mrb[2].mxu1 }
 0x2a5   : > { %1209 = vrot.lane.b32.xlu1 %v3142_v36, %s2792_s13  ;;  %v2476_v45 = vpop.f32.mrb[3].mxu1 }
 0x2a6   : > { %v3154_v46 = vpop.f32.mrb[4].mxu0 }
 0x2a7   : > { %1189 = vrot.lane.b32.xlu0 %v3150_v44, %s2797_s6  ;;  %v2481_v47 = vpop.f32.mrb[5].mxu0 }
 0x2a8   : > { %v3158_v48 = vpop.f32.mrb[4].mxu1 }
 0x2a9   : > { %1233 = vrot.lane.b32.xlu1 %v3142_v36, %s2793_s12  ;;  %v2486_v49 = vpop.f32.mrb[5].mxu1 }
 0x2aa   : > { %v3162_v51 = vpop.f32.mrb[6].mxu0 }
 0x2ab   : > { %1237 = vrot.lane.b32.xlu0 %v3150_v44, %s2793_s12  ;;  %v2491_v52 = vpop.f32.mrb[7].mxu0 }
 0x2ac   : > { %v3166_v53 = vpop.f32.mrb[6].mxu1 }
 0x2ad   : > { %v2496_v54 = vpop.f32.mrb[7].mxu1  ;;  %1187 = vrot.lane.b32.xlu1 %v3146_v41, %s2797_s6 }
 0x2ae   : > { %v3170_v55 = vpop.f32.mrb[8].mxu0 }
 0x2af   : > { %1191 = vrot.lane.b32.xlu0 %v3154_v46, %s2797_s6  ;;  %v2501_v56 = vpop.f32.mrb[9].mxu0 }
 0x2b1   : > { %1235 = vrot.lane.b32.xlu1 %v3146_v41, %s2793_s12 }
 0x2b3   : > { %1215 = vrot.lane.b32.xlu0 %v3154_v46, %s2792_s13 }
 0x2b5   : > { %1213 = vrot.lane.b32.xlu1 %v3150_v44, %s2792_s13 }
 0x2b7   : > { %1239 = vrot.lane.b32.xlu0 %v3154_v46, %s2793_s12 }
 0x2b9   : > { %1193 = vrot.lane.b32.xlu1 %v3158_v48, %s2797_s6 }
 0x2bb   : > { %1217 = vrot.lane.b32.xlu0 %v3158_v48, %s2792_s13 }
 0x2bd   : > { %1241 = vrot.lane.b32.xlu1 %v3158_v48, %s2793_s12 }
 0x2bf   : > { %1195 = vrot.lane.b32.xlu0 %v3162_v51, %s2797_s6 }
 0x2c1   : > { %1219 = vrot.lane.b32.xlu1 %v3162_v51, %s2792_s13 }
 0x2c3   : > { %1243 = vrot.lane.b32.xlu0 %v3162_v51, %s2793_s12 }
 0x2c5   : > { %1197 = vrot.lane.b32.xlu1 %v3166_v53, %s2797_s6 }
 0x2c7   : > { %1221 = vrot.lane.b32.xlu0 %v3166_v53, %s2792_s13 }
 0x2c9   : > { %1245 = vrot.lane.b32.xlu1 %v3166_v53, %s2793_s12 }
 0x2cb   : > { %1199 = vrot.lane.b32.xlu0 %v3170_v55, %s2797_s6 }
 0x2cd   : > { %1223 = vrot.lane.b32.xlu1 %v3170_v55, %s2792_s13  ;;  %s2697_s13 = scalar_lea.vmem %s2696_s22, 256 }
 0x2ce   : > { %p2699_p4 = scmp.lt.s32.totalorder %s2697_s13, %s2691_s11 }
 0x2cf   : > { %1247 = vrot.lane.b32.xlu0 %v3170_v55, %s2793_s12 }
 0x2d0   : > { %p2700_p6 = por %p2699_p4, %p2698_p3 }
 0x2d1   : > { %1567 = vbcast.lane.b32.xlu1 %v1564_v60, 264 }
 0x2d2   : > { %p2701_p11 = pnand %p2700_p6, %p2694_p0 }
 0x2d3   : > { %1575 = vbcast.lane.b32.xlu0 %v1572_v62, 264 }
 0x2d5   : > { %1583 = vbcast.lane.b32.xlu1 %v1580_v1, 264 }
 0x2d7   : > { %1591 = vbcast.lane.b32.xlu0 %v1588_v2, 264 }
 0x2d9   : > { %1856 = vbcast.lane.b32.xlu1 %v3072_v38, 260 }
 0x2db   : > { %1860 = vbcast.lane.b32.xlu0 %v3077_v39, 260 }
 0x2dd   : > { %1852 = vbcast.lane.b32.xlu1 %v3080_v40, 260 }
 0x2df   : > { %1864 = vbcast.lane.b32.xlu0 %v3086_v42, 260 }
 0x2e1   : > { %1868 = vbcast.lane.b32.xlu1 %v1564_v60, 260 }
 0x2e3   : > { %1872 = vbcast.lane.b32.xlu0 %v1572_v62, 260 }
 0x2e5   : > { %1876 = vbcast.lane.b32.xlu1 %v1580_v1, 260 }
 0x2e7   : > { %1880 = vbcast.lane.b32.xlu0 %v1588_v2, 260 }
 0x313   : > { %v1186_v8 = vpop.permute.xlu1 %1185 }
 0x315   : > { %v1212_v9 = vpop.permute.xlu0 %1211 }
 0x316   : > { %v1291_v17 = vcombine.low %v3146_v41, %v1212_v9 }
 0x317   : > { %v1210_v38 = vpop.permute.xlu1 %1209 }
 0x318   : > { %v1257_v39 = vcombine.low %v3142_v36, %v1210_v38  ;;  %v1298_v27 = vrot.slane %v1291_v17, %v3090_v50 }
 0x319   : > { %v1190_v10 = vpop.permute.xlu0 %1189 }
 0x31a   : > { %v1264_v12 = vrot.slane %v1257_v39, %v3090_v50 }
 0x31b   : > { %v1234_v40 = vpop.permute.xlu1 %1233 }
 0x31c   : > { %v1265_v11 = vcombine.low %v1186_v8, %v1234_v40 }
 0x31d   : > { %v1238_v42 = vpop.permute.xlu0 %1237 }
 0x31e   : > { %v1272_v13 = vrot.slane %v1265_v11, %v3090_v50  ;;  %v1333_v21 = vcombine.low %v1190_v10, %v1238_v42 }
 0x31f   : > { %v1188_v14 = vpop.permute.xlu1 %1187 }
 0x320   : > { %v1273_v15 = vcombine.low %v1264_v12, %v1272_v13  ;;  %v1274_v16 = vcombine.high %v1264_v12, %v1272_v13  ;;  %v1340_v47 = vrot.slane %v1333_v21, %v3090_v50 }
 0x321   : > { %v1192_v18 = vpop.permute.xlu0 %1191 }
 0x322   : > { %v1281_v19 = vrot.slane %v1273_v15, %v3095_v57  ;;  %v1288_v20 = vrot.slane %v1274_v16, %v3095_v57 }
 0x323   : > { %v1236_v22 = vpop.permute.xlu1 %1235 }
 0x324   : > { %v1289_v23 = vcombine.high %v1281_v19, %v2788_v0  ;;  %v1290_v24 = vcombine.high %v1288_v20, %v2788_v0  ;;  %v1593_v25 = vmul.f32 %v1536_v6, %v1281_v19  ;;  %v1595_v26 = vmul.f32 %v1536_v6, %v1288_v20 }
 0x325   : > { %v1299_v28 = vcombine.low %v1188_v14, %v1236_v22  ;;  %v1216_v29 = vpop.permute.xlu0 %1215 }
 0x326   : > { %v1594_v30 = vmul.f32 %v1536_v6, %v1289_v23  ;;  %v1596_v31 = vmul.f32 %v1536_v6, %v1290_v24  ;;  %v1626_v32 = vsel %vm1625_vm4, %v1593_v25, 0.0  ;;  %v1640_v33 = vsel %vm1625_vm4, %v1595_v26, 0.0 }
 0x327   : > { %v1627_v34 = vrot.slane %v1626_v32, 4  ;;  %v1641_v35 = vrot.slane %v1640_v33, 4  ;;  %v1306_v36 = vrot.slane %v1299_v28, %v3090_v50  ;;  %v1359_v37 = vcombine.low %v3154_v46, %v1216_v29  ;;  %v1214_v41 = vpop.permute.xlu1 %1213 }
 0x328   : > { %v1633_v43 = vsel %vm1625_vm4, %v1594_v30, 0.0  ;;  %v1647_v45 = vsel %vm1625_vm4, %v1596_v31, 0.0  ;;  %v1325_v49 = vcombine.low %v3150_v44, %v1214_v41 }
 0x329   : > { %v3241_v52 = vadd.f32 %v1627_v34, %v1626_v32  ;;  %v1634_v54 = vrot.slane %v1633_v43, 4  ;;  %v1642_v56 = vadd.f32 %v1641_v35, %v1640_v33  ;;  %v1648_v58 = vrot.slane %v1647_v45, 4  ;;  %v1240_v59 = vpop.permute.xlu0 %1239 }
 0x32a   : > { %v1307_v60 = vcombine.low %v1298_v27, %v1306_v36  ;;  %v1308_v61 = vcombine.high %v1298_v27, %v1306_v36  ;;  %v1366_v62 = vrot.slane %v1359_v37, %v3090_v50  ;;  %v1332_v46 = vrot.slane %v1325_v49, %v3090_v50 }
 0x32b   : > { %v3245_v63 = vadd.f32 %v1634_v54, %v1633_v43  ;;  %v1643_v1 = vrot.slane %v1642_v56, 2  ;;  %v3247_v2 = vadd.f32 %v1648_v58, %v1647_v45  ;;  %v1367_v6 = vcombine.low %v1192_v18, %v1240_v59  ;;  %v3249_v8 = vpop.permute.xlu1 %1193 }
 0x32c   : > { %v1315_v44 = vrot.slane %v1307_v60, %v3095_v57  ;;  %v1322_v9 = vrot.slane %v1308_v61, %v3095_v57  ;;  %v1341_v38 = vcombine.low %v1332_v46, %v1340_v47  ;;  %v1342_v10 = vcombine.high %v1332_v46, %v1340_v47  ;;  %v2165_v61 = vld [vmem:[%s3595_s3] sm:$0xf] }
 0x32d   : > { %v1374_v39 = vrot.slane %v1367_v6, %v3090_v50  ;;  %v3254_v40 = vpop.permute.xlu0 %1217  ;;  %v1629_v11 = vrot.slane %v3241_v52, 2  ;;  %v1636_v42 = vrot.slane %v3245_v63, 2  ;;  %v3258_v12 = vadd.f32 %v1643_v1, %v1642_v56  ;;  %2503 = vmatpush3.msk.msra.mxu1 %vm326_vm1, %v2165_v61 }
 0x32e   : > { %v1323_v13 = vcombine.high %v1315_v44, %v2788_v0  ;;  %v1324_v14 = vcombine.high %v1322_v9, %v2788_v0  ;;  %v1597_v15 = vmul.f32 %v3218_v7, %v1315_v44  ;;  %v1599_v16 = vmul.f32 %v3218_v7, %v1322_v9 }
 0x32f   : > { %v1349_v17 = vrot.slane %v1341_v38, %v3095_v57  ;;  %v1356_v18 = vrot.slane %v1342_v10, %v3095_v57  ;;  %v1375_v19 = vcombine.low %v1366_v62, %v1374_v39  ;;  %v1376_v20 = vcombine.high %v1366_v62, %v1374_v39  ;;  %v3266_v21 = vpop.permute.xlu1 %1241 }
 0x330   : > { %v1598_v22 = vmul.f32 %v3218_v7, %v1323_v13  ;;  %v1600_v23 = vmul.f32 %v3218_v7, %v1324_v14  ;;  %v1654_v24 = vsel %vm1625_vm4, %v1597_v15, 0.0  ;;  %v1668_v25 = vsel %vm1625_vm4, %v1599_v16, 0.0 }
 0x331   : > { %v1655_v26 = vrot.slane %v1654_v24, 4  ;;  %v1669_v27 = vrot.slane %v1668_v25, 4  ;;  %v1357_v28 = vcombine.high %v1349_v17, %v2788_v0  ;;  %v1358_v29 = vcombine.high %v1356_v18, %v2788_v0  ;;  %v1196_v30 = vpop.permute.xlu0 %1195 }
 0x332   : > { %v1661_v31 = vsel %vm1625_vm4, %v1598_v22, 0.0  ;;  %v1675_v32 = vsel %vm1625_vm4, %v1600_v23, 0.0  ;;  %v1601_v33 = vmul.f32 %v3220_v5, %v1349_v17  ;;  %v1603_v34 = vmul.f32 %v3220_v5, %v1356_v18 }
 0x333   : > { %v3278_v7 = vadd.f32 %v1655_v26, %v1654_v24  ;;  %v1662_v35 = vrot.slane %v1661_v31, 4  ;;  %v3280_v36 = vadd.f32 %v1669_v27, %v1668_v25  ;;  %v1676_v37 = vrot.slane %v1675_v32, 4  ;;  %v1220_v41 = vpop.permute.xlu1 %1219 }
 0x334   : > { %v1602_v43 = vmul.f32 %v3220_v5, %v1357_v28  ;;  %v1604_v45 = vmul.f32 %v3220_v5, %v1358_v29  ;;  %v1682_v47 = vsel %vm1625_vm4, %v1601_v33, 0.0  ;;  %v1696_v49 = vsel %vm1625_vm4, %v1603_v34, 0.0 }
 0x335   : > { %v3286_v54 = vadd.f32 %v1662_v35, %v1661_v31  ;;  %v1671_v56 = vrot.slane %v3280_v36, 2  ;;  %v3289_v58 = vadd.f32 %v1676_v37, %v1675_v32  ;;  %v1683_v59 = vrot.slane %v1682_v47, 4  ;;  %v1244_v60 = vpop.permute.xlu0 %1243 }
 0x336   : > { %v1689_v62 = vsel %vm1625_vm4, %v1602_v43, 0.0  ;;  %v1697_v46 = vrot.slane %v1696_v49, 4  ;;  %v1703_v5 = vsel %vm1625_vm4, %v1604_v45, 0.0  ;;  %v1383_v1 = vrot.slane %v1375_v19, %v3095_v57 }
 0x337   : > { %v3298_v6 = vadd.f32 %v1683_v59, %v1682_v47  ;;  %v1690_v44 = vrot.slane %v1689_v62, 4  ;;  %v1704_v9 = vrot.slane %v1703_v5, 4  ;;  %v1390_v38 = vrot.slane %v1376_v20, %v3095_v57  ;;  %v1198_v10 = vpop.permute.xlu1 %1197 }
 0x338   : > { %v3301_v39 = vadd.f32 %v1697_v46, %v1696_v49  ;;  %v1391_v13 = vcombine.high %v1383_v1, %v2788_v0  ;;  %v1605_v14 = vmul.f32 %v3222_v3, %v1383_v1  ;;  %v1393_v15 = vcombine.low %v3158_v48, %v3254_v40 }
 0x339   : > { %v3307_v16 = vadd.f32 %v1690_v44, %v1689_v62  ;;  %v3309_v17 = vadd.f32 %v1704_v9, %v1703_v5  ;;  %v1392_v18 = vcombine.high %v1390_v38, %v2788_v0  ;;  %v1607_v19 = vmul.f32 %v3222_v3, %v1390_v38  ;;  %v1222_v22 = vpop.permute.xlu0 %1221 }
 0x33a   : > { %v1699_v20 = vrot.slane %v3301_v39, 2  ;;  %v1606_v23 = vmul.f32 %v3222_v3, %v1391_v13  ;;  %v1710_v24 = vsel %vm1625_vm4, %v1605_v14, 0.0  ;;  %v1400_v25 = vrot.slane %v1393_v15, %v3090_v50 }
 0x33b   : > { %v1608_v26 = vmul.f32 %v3222_v3, %v1392_v18  ;;  %v1711_v48 = vrot.slane %v1710_v24, 4  ;;  %v1724_v40 = vsel %vm1625_vm4, %v1607_v19, 0.0  ;;  %v1401_v27 = vcombine.low %v3249_v8, %v3266_v21  ;;  %v1246_v28 = vpop.permute.xlu1 %1245 }
 0x33c   : > { %v1717_v29 = vsel %vm1625_vm4, %v1606_v23, 0.0  ;;  %v1725_v31 = vrot.slane %v1724_v40, 4  ;;  %v1427_v32 = vcombine.low %v3162_v51, %v1220_v41  ;;  %v1435_v33 = vcombine.low %v1196_v30, %v1244_v60 }
 0x33d   : > { %v3323_v34 = vadd.f32 %v1711_v48, %v1710_v24  ;;  %v1718_v35 = vrot.slane %v1717_v29, 4  ;;  %v1731_v37 = vsel %vm1625_vm4, %v1608_v26, 0.0  ;;  %v1408_v3 = vrot.slane %v1401_v27, %v3090_v50  ;;  %v1200_v43 = vpop.permute.xlu0 %1199 }
 0x33e   : > { %v3327_v45 = vadd.f32 %v1725_v31, %v1724_v40  ;;  %v1732_v47 = vrot.slane %v1731_v37, 4  ;;  %v1434_v8 = vrot.slane %v1427_v32, %v3090_v50  ;;  %v1442_v21 = vrot.slane %v1435_v33, %v3090_v50 }
 0x33f   : > { %v3331_v49 = vadd.f32 %v1718_v35, %v1717_v29  ;;  %v1409_v59 = vcombine.low %v1400_v25, %v1408_v3  ;;  %v1410_v51 = vcombine.high %v1400_v25, %v1408_v3  ;;  %v1461_v30 = vcombine.low %v3166_v53, %v1222_v22  ;;  %v1224_v41 = vpop.permute.xlu1 %1223 }
 0x340   : > { %v1727_v60 = vrot.slane %v3327_v45, 2  ;;  %v3335_v61 = vadd.f32 %v1732_v47, %v1731_v37  ;;  %v1443_v62 = vcombine.low %v1434_v8, %v1442_v21  ;;  %v1444_v46 = vcombine.high %v1434_v8, %v1442_v21 }
 0x341   : > { %v1417_v5 = vrot.slane %v1409_v59, %v3095_v57  ;;  %v1424_v1 = vrot.slane %v1410_v51, %v3095_v57  ;;  %v1468_v44 = vrot.slane %v1461_v30, %v3090_v50  ;;  %v1469_v9 = vcombine.low %v1198_v10, %v1246_v28  ;;  %v1248_v38 = vpop.permute.xlu0 %1247 }
 0x342   : > { %v1451_v13 = vrot.slane %v1443_v62, %v3095_v57  ;;  %v1458_v14 = vrot.slane %v1444_v46, %v3095_v57  ;;  %v1495_v53 = vcombine.low %v3170_v55, %v1224_v41  ;;  %v1503_v15 = vcombine.low %v1200_v43, %v1248_v38 }
 0x343   : > { %v1476_v18 = vrot.slane %v1469_v9, %v3090_v50  ;;  %v1425_v19 = vcombine.high %v1417_v5, %v2788_v0  ;;  %v1426_v22 = vcombine.high %v1424_v1, %v2788_v0  ;;  %v1568_v23 = vpop.permute.xlu1 %1567  ;;  %v1657_v24 = vrot.slane %v3278_v7, 2 }
 0x344   : > { %v1502_v25 = vrot.slane %v1495_v53, %v3090_v50  ;;  %v1510_v10 = vrot.slane %v1503_v15, %v3090_v50  ;;  %v1609_v26 = vmul.f32 %v1568_v23, %v1417_v5  ;;  %v1611_v48 = vmul.f32 %v1568_v23, %v1424_v1 }
 0x345   : > { %v1477_v40 = vcombine.low %v1468_v44, %v1476_v18  ;;  %v1478_v27 = vcombine.high %v1468_v44, %v1476_v18  ;;  %v1610_v28 = vmul.f32 %v1568_v23, %v1425_v19  ;;  %v1612_v55 = vmul.f32 %v1568_v23, %v1426_v22  ;;  %v1576_v50 = vpop.permute.xlu0 %1575 }
 0x346   : > { %v1511_v29 = vcombine.low %v1502_v25, %v1510_v10  ;;  %v1512_v31 = vcombine.high %v1502_v25, %v1510_v10  ;;  %v1738_v32 = vsel %vm1625_vm4, %v1609_v26, 0.0  ;;  %v1752_v33 = vsel %vm1625_vm4, %v1611_v48, 0.0 }
 0x347   : > { %v1485_v35 = vrot.slane %v1477_v40, %v3095_v57  ;;  %v1492_v37 = vrot.slane %v1478_v27, %v3095_v57  ;;  %v1739_v3 = vrot.slane %v1738_v32, 4  ;;  %v1745_v43 = vsel %vm1625_vm4, %v1610_v28, 0.0  ;;  %v1584_v48 = vpop.permute.xlu1 %1583 }
 0x348   : > { %v3355_v47 = vrot.slane %v1511_v29, %v3095_v57  ;;  %v3358_v8 = vrot.slane %v1512_v31, %v3095_v57  ;;  %v1746_v21 = vrot.slane %v1745_v43, 4  ;;  %v1753_v59 = vrot.slane %v1752_v33, 4 }
 0x349   : > { %v3360_v51 = vadd.f32 %v1739_v3, %v1738_v32  ;;  %v1759_v30 = vsel %vm1625_vm4, %v1612_v55, 0.0  ;;  %v1459_v41 = vcombine.high %v1451_v13, %v2788_v0  ;;  %v1460_v62 = vcombine.high %v1458_v14, %v2788_v0 }
 0x34a   : > { %v1747_v46 = vadd.f32 %v1746_v21, %v1745_v43  ;;  %v1754_v5 = vadd.f32 %v1753_v59, %v1752_v33  ;;  %v1760_v1 = vrot.slane %v1759_v30, 4  ;;  %v1613_v44 = vmul.f32 %v1576_v50, %v1451_v13 }
 0x34b   : > { %v1741_v9 = vrot.slane %v3360_v51, 2  ;;  %v1614_v38 = vmul.f32 %v1576_v50, %v1459_v41  ;;  %v1615_v53 = vmul.f32 %v1576_v50, %v1458_v14  ;;  %v1616_v57 = vmul.f32 %v1576_v50, %v1460_v62 }
 0x34c   : > { %v1748_v15 = vrot.slane %v1747_v46, 2  ;;  %v1755_v18 = vrot.slane %v1754_v5, 2  ;;  %v1761_v19 = vadd.f32 %v1760_v1, %v1759_v30  ;;  %v1766_v22 = vsel %vm1625_vm4, %v1613_v44, 0.0 }
 0x34d   : > { %v1767_v23 = vrot.slane %v1766_v22, 4  ;;  %v1773_v25 = vsel %vm1625_vm4, %v1614_v38, 0.0  ;;  %v1780_v10 = vsel %vm1625_vm4, %v1615_v53, 0.0  ;;  %v1787_v26 = vsel %vm1625_vm4, %v1616_v57, 0.0 }
 0x34e   : > { %v3370_v40 = vadd.f32 %v1748_v15, %v1747_v46  ;;  %v3372_v13 = vadd.f32 %v1755_v18, %v1754_v5  ;;  %v1762_v27 = vrot.slane %v1761_v19, 2  ;;  %v1774_v14 = vrot.slane %v1773_v25, 4 }
 0x34f   : > { %v3374_v28 = vadd.f32 %v1767_v23, %v1766_v22  ;;  %v1781_v55 = vrot.slane %v1780_v10, 4  ;;  %v1788_v29 = vrot.slane %v1787_v26, 4  ;;  %v1493_v31 = vcombine.high %v1485_v35, %v2788_v0 }
 0x350   : > { %v3377_v32 = vadd.f32 %v1762_v27, %v1761_v19  ;;  %v1775_v33 = vadd.f32 %v1774_v14, %v1773_v25  ;;  %v1494_v3 = vcombine.high %v1492_v37, %v2788_v0  ;;  %v1617_v43 = vmul.f32 %v1584_v48, %v1485_v35  ;;  %v1592_v19 = vpop.permute.xlu0 %1591 }
 0x351   : > { %v1769_v50 = vrot.slane %v3374_v28, 2  ;;  %v1782_v21 = vadd.f32 %v1781_v55, %v1780_v10  ;;  %v1789_v59 = vadd.f32 %v1788_v29, %v1787_v26  ;;  %v1618_v30 = vmul.f32 %v1584_v48, %v1493_v31 }
 0x352   : > { %v1776_v41 = vrot.slane %v1775_v33, 2  ;;  %v1619_v62 = vmul.f32 %v1584_v48, %v1492_v37  ;;  %v1620_v46 = vmul.f32 %v1584_v48, %v1494_v3  ;;  %v1794_v5 = vsel %vm1625_vm4, %v1617_v43, 0.0 }
 0x353   : > { %v1783_v1 = vrot.slane %v1782_v21, 2  ;;  %v1790_v44 = vrot.slane %v1789_v59, 2  ;;  %v1795_v38 = vrot.slane %v1794_v5, 4  ;;  %v1801_v53 = vsel %vm1625_vm4, %v1618_v30, 0.0 }
 0x354   : > { %v3383_v57 = vadd.f32 %v1776_v41, %v1775_v33  ;;  %v1802_v15 = vrot.slane %v1801_v53, 4  ;;  %v1808_v35 = vsel %vm1625_vm4, %v1619_v62, 0.0  ;;  %v1815_v18 = vsel %vm1625_vm4, %v1620_v46, 0.0 }
 0x355   : > { %v3387_v22 = vadd.f32 %v1783_v1, %v1782_v21  ;;  %v3389_v23 = vadd.f32 %v1790_v44, %v1789_v59  ;;  %v3391_v37 = vadd.f32 %v1795_v38, %v1794_v5  ;;  %v1809_v25 = vrot.slane %v1808_v35, 4 }
 0x356   : > { %v1803_v10 = vadd.f32 %v1802_v15, %v1801_v53  ;;  %v1816_v26 = vrot.slane %v1815_v18, 4  ;;  %v1527_v48 = vcombine.high %v3355_v47, %v2788_v0  ;;  %v1528_v27 = vcombine.high %v3358_v8, %v2788_v0 }
 0x357   : > { %v1797_v14 = vrot.slane %v3391_v37, 2  ;;  %v1810_v55 = vadd.f32 %v1809_v25, %v1808_v35  ;;  %v1621_v29 = vmul.f32 %v1592_v19, %v3355_v47  ;;  %v1623_v31 = vmul.f32 %v1592_v19, %v3358_v8 }
 0x358   : > { %v1804_v33 = vrot.slane %v1803_v10, 2  ;;  %v1817_v3 = vadd.f32 %v1816_v26, %v1815_v18  ;;  %v1622_v43 = vmul.f32 %v1592_v19, %v1527_v48  ;;  %v1624_v21 = vmul.f32 %v1592_v19, %v1528_v27 }
 0x359   : > { %v1811_v59 = vrot.slane %v1810_v55, 2  ;;  %v1822_v30 = vsel %vm1625_vm4, %v1621_v29, 0.0  ;;  %v1836_v41 = vsel %vm1625_vm4, %v1623_v31, 0.0  ;;  %v1658_v0 = vadd.f32 %v1657_v24, %v3278_v7 }
 0x35a   : > { %v3405_v62 = vadd.f32 %v1804_v33, %v1803_v10  ;;  %v1818_v46 = vrot.slane %v1817_v3, 2  ;;  %v1823_v5 = vrot.slane %v1822_v30, 4  ;;  %v1829_v47 = vsel %vm1625_vm4, %v1622_v43, 0.0  ;;  %v1857_v10 = vpop.permute.xlu1 %1856 }
 0x35b   : > { %v3408_v8 = vadd.f32 %v1811_v59, %v1810_v55  ;;  %v1830_v1 = vrot.slane %v1829_v47, 4  ;;  %v1837_v44 = vrot.slane %v1836_v41, 4  ;;  %v1843_v38 = vsel %vm1625_vm4, %v1624_v21, 0.0 }
 0x35c   : > { %v3411_v53 = vadd.f32 %v1818_v46, %v1817_v3  ;;  %v3413_v15 = vadd.f32 %v1823_v5, %v1822_v30  ;;  %v1844_v35 = vrot.slane %v1843_v38, 4  ;;  %v1659_v18 = vrot.slane %v1658_v0, 1  ;;  %v1861_v46 = vpop.permute.xlu0 %1860 }
 0x35d   : > { %v1831_v19 = vadd.f32 %v1830_v1, %v1829_v47  ;;  %v1838_v7 = vadd.f32 %v1837_v44, %v1836_v41  ;;  %v1664_v24 = vrot.slane %v3286_v54, 2  ;;  %v1672_v25 = vadd.f32 %v1671_v56, %v3280_v36 }
 0x35e   : > { %v1825_v26 = vrot.slane %v3413_v15, 2  ;;  %v1845_v48 = vadd.f32 %v1844_v35, %v1843_v38  ;;  %v1660_v27 = vadd.f32 %v1659_v18, %v1658_v0  ;;  %v1678_v55 = vrot.slane %v3289_v58, 2 }
 0x35f   : > { %v1832_v29 = vrot.slane %v1831_v19, 2  ;;  %v1839_v31 = vrot.slane %v1838_v7, 2  ;;  %v1665_v33 = vadd.f32 %v1664_v24, %v3286_v54  ;;  %v1673_v3 = vrot.slane %v1672_v25, 1 }
 0x360   : > { %v1846_v43 = vrot.slane %v1845_v48, 2  ;;  %v1679_v21 = vadd.f32 %v1678_v55, %v3289_v58  ;;  %v1893_v59 = vrot.slane %v1857_v10, 1  ;;  %v1894_v36 = vrot.slane %v1857_v10, 2 }
 0x361   : > { %v3423_v56 = vadd.f32 %v1832_v29, %v1831_v19  ;;  %v3425_v30 = vadd.f32 %v1839_v31, %v1838_v7  ;;  %v1666_v41 = vrot.slane %v1665_v33, 1  ;;  %v1674_v0 = vadd.f32 %v1673_v3, %v1672_v25 }
 0x362   : > { %v3427_v5 = vadd.f32 %v1846_v43, %v1845_v48  ;;  %v1680_v47 = vrot.slane %v1679_v21, 1  ;;  %v1895_v1 = vrot.slane %v1857_v10, 3  ;;  %v1950_v54 = vmul.f32 %v1857_v10, %v1660_v27 }
 0x363   : > { %v1667_v44 = vadd.f32 %v1666_v41, %v1665_v33  ;;  %v1952_v38 = vmul.f32 %v1894_v36, %v1674_v0  ;;  %v1685_v35 = vrot.slane %v3298_v6, 2  ;;  %v1692_v58 = vrot.slane %v3307_v16, 2 }
 0x364   : > { %v1681_v18 = vadd.f32 %v1680_v47, %v1679_v21  ;;  %v1700_v19 = vadd.f32 %v1699_v20, %v3301_v39  ;;  %v1706_v7 = vrot.slane %v3309_v17, 2  ;;  %v1896_v24 = vrot.slane %v1861_v46, 1 }
 0x365   : > { %v1951_v25 = vmul.f32 %v1893_v59, %v1667_v44  ;;  %v2021_v48 = vrot.slane %v1952_v38, 6  ;;  %v1686_v55 = vadd.f32 %v1685_v35, %v3298_v6  ;;  %v1693_v10 = vadd.f32 %v1692_v58, %v3307_v16 }
 0x366   : > { %v1953_v27 = vmul.f32 %v1895_v1, %v1681_v18  ;;  %v1701_v29 = vrot.slane %v1700_v19, 1  ;;  %v1707_v31 = vadd.f32 %v1706_v7, %v3309_v17  ;;  %v1897_v33 = vrot.slane %v1861_v46, 2  ;;  %v1853_v7 = vpop.permute.xlu1 %1852 }
 0x367   : > { %v2019_v3 = vrot.slane %v1951_v25, 7  ;;  %v1687_v43 = vrot.slane %v1686_v55, 1  ;;  %v1694_v21 = vrot.slane %v1693_v10, 1  ;;  %v1898_v36 = vrot.slane %v1861_v46, 3 }
 0x368   : > { %v2023_v41 = vrot.slane %v1953_v27, 5  ;;  %v1702_v39 = vadd.f32 %v1701_v29, %v1700_v19  ;;  %v1708_v20 = vrot.slane %v1707_v31, 1  ;;  %v1630_v59 = vadd.f32 %v1629_v11, %v3241_v52 }
 0x369   : > { %v2020_v6 = vsel %vm2011_vm5, %v2019_v3, %v1950_v54  ;;  %v1688_v0 = vadd.f32 %v1687_v43, %v1686_v55  ;;  %v1695_v16 = vadd.f32 %v1694_v21, %v1693_v10  ;;  %v1637_v17 = vadd.f32 %v1636_v42, %v3245_v63 }
 0x36a   : > { %v2022_v47 = vsel %vm2014_vm6, %v2021_v48, %v2020_v6  ;;  %v1709_v1 = vadd.f32 %v1708_v20, %v1707_v31  ;;  %v1956_v44 = vmul.f32 %v1897_v33, %v1702_v39  ;;  %v1631_v38 = vrot.slane %v1630_v59, 1 }
 0x36b   : > { %v2024_v35 = vsel %vm2017_vm7, %v2023_v41, %v2022_v47  ;;  %v1954_v58 = vmul.f32 %v1861_v46, %v1688_v0  ;;  %v1955_v18 = vmul.f32 %v1896_v24, %v1695_v16  ;;  %v1638_v19 = vrot.slane %v1637_v17, 1 }
 0x36c   : > { %v2076_v52 = vsel %vm1625_vm4, %v2024_v35, 0.0  ;;  %v1957_v11 = vmul.f32 %v1898_v36, %v1709_v1  ;;  %v2027_v54 = vrot.slane %v1956_v44, 6  ;;  %v1632_v25 = vadd.f32 %v1631_v38, %v1630_v59 }
 0x36d   : > { %v2077_v55 = vrot.slane %v2076_v52, 4  ;;  %v2025_v10 = vrot.slane %v1955_v18, 7  ;;  %v1639_v27 = vadd.f32 %v1638_v19, %v1637_v17  ;;  %v1645_v63 = vrot.slane %v3258_v12, 1  ;;  %v1865_v19 = vpop.permute.xlu0 %1864 }
 0x36e   : > { %v2029_v42 = vrot.slane %v1957_v11, 5  ;;  %v1650_v48 = vrot.slane %v3247_v2, 2  ;;  %v1890_v29 = vrot.slane %v1853_v7, 1  ;;  %v1891_v31 = vrot.slane %v1853_v7, 2 }
 0x36f   : > { %v2078_v33 = vadd.f32 %v2077_v55, %v2076_v52  ;;  %v2026_v46 = vsel %vm2011_vm5, %v2025_v10, %v1954_v58  ;;  %v1646_v24 = vadd.f32 %v1645_v63, %v3258_v12  ;;  %v1892_v3 = vrot.slane %v1853_v7, 3 }
 0x370   : > { %v2028_v43 = vsel %vm2014_vm6, %v2027_v54, %v2026_v46  ;;  %v1651_v21 = vadd.f32 %v1650_v48, %v3247_v2  ;;  %v1946_v36 = vmul.f32 %v1853_v7, %v1632_v25  ;;  %v1947_v41 = vmul.f32 %v1890_v29, %v1639_v27 }
 0x371   : > { %v2079_v39 = vrot.slane %v2078_v33, 2  ;;  %v2030_v20 = vsel %vm2017_vm7, %v2029_v42, %v2028_v43  ;;  %v1948_v59 = vmul.f32 %v1891_v31, %v1646_v24  ;;  %v1713_v6 = vrot.slane %v3323_v34, 2 }
 0x372   : > { %v2083_v0 = vsel %vm1625_vm4, %v2030_v20, 0.0  ;;  %v1652_v16 = vrot.slane %v1651_v21, 1  ;;  %v2010_v17 = vrot.slane %v1947_v41, 7  ;;  %v1720_v47 = vrot.slane %v3331_v49, 2 }
 0x373   : > { %v2080_v12 = vadd.f32 %v2079_v39, %v2078_v33  ;;  %v2084_v1 = vrot.slane %v2083_v0, 4  ;;  %v2013_v44 = vrot.slane %v1948_v59, 6  ;;  %v1714_v38 = vadd.f32 %v1713_v6, %v3323_v34 }
 0x374   : > { %v1653_v2 = vadd.f32 %v1652_v16, %v1651_v21  ;;  %v2012_v35 = vsel %vm2011_vm5, %v2010_v17, %v1946_v36  ;;  %v1721_v58 = vadd.f32 %v1720_v47, %v3331_v49  ;;  %v1728_v18 = vadd.f32 %v1727_v60, %v3327_v45 }
 0x375   : > { %v2081_v7 = vrot.slane %v2080_v12, 1  ;;  %v2085_v52 = vadd.f32 %v2084_v1, %v2083_v0  ;;  %v2015_v11 = vsel %vm2014_vm6, %v2013_v44, %v2012_v35  ;;  %v1715_v54 = vrot.slane %v1714_v38, 1 }
 0x376   : > { %v1949_v25 = vmul.f32 %v1892_v3, %v1653_v2  ;;  %v1722_v55 = vrot.slane %v1721_v58, 1  ;;  %v1729_v10 = vrot.slane %v1728_v18, 1  ;;  %v1734_v34 = vrot.slane %v3335_v61, 2 }
 0x377   : > { %v2082_v27 = vadd.f32 %v2081_v7, %v2080_v12  ;;  %v2086_v63 = vrot.slane %v2085_v52, 2  ;;  %v1716_v42 = vadd.f32 %v1715_v54, %v1714_v38  ;;  %v1899_v48 = vrot.slane %v1865_v19, 1 }
 0x378   : > { %v2016_v49 = vrot.slane %v1949_v25, 5  ;;  %v1723_v29 = vadd.f32 %v1722_v55, %v1721_v58  ;;  %v1730_v31 = vadd.f32 %v1729_v10, %v1728_v18  ;;  %v1735_v45 = vadd.f32 %v1734_v34, %v3335_v61  ;;  %v1869_v58 = vpop.permute.xlu1 %1868 }
 0x379   : > { %v3467_v60 = vmul.f32 0.999995, %v2082_v27  ;;  %v2087_v33 = vadd.f32 %v2086_v63, %v2085_v52  ;;  %v1900_v46 = vrot.slane %v1865_v19, 2  ;;  %v1901_v24 = vrot.slane %v1865_v19, 3 }
 0x37a   : > { %v2018_v3 = vsel %vm2017_vm7, %v2016_v49, %v2015_v11  ;;  %v1736_v43 = vrot.slane %v1735_v45, 1  ;;  %v1958_v21 = vmul.f32 %v1865_v19, %v1716_v42  ;;  %v1959_v36 = vmul.f32 %v1899_v48, %v1723_v29 }
 0x37b   : > { %v2141_v41 = vrot.slane %v3467_v60, 7  ;;  %v2088_v39 = vrot.slane %v2087_v33, 1  ;;  %v2069_v20 = vsel %vm1625_vm4, %v2018_v3, 0.0  ;;  %v1960_v59 = vmul.f32 %v1900_v46, %v1730_v31 }
 0x37c   : > { %v2070_v6 = vrot.slane %v2069_v20, 4  ;;  %v1737_v0 = vadd.f32 %v1736_v43, %v1735_v45  ;;  %v2031_v16 = vrot.slane %v1959_v36, 7  ;;  %v1742_v61 = vadd.f32 %v1741_v9, %v3360_v51 }
 0x37d   : > { %v2089_v17 = vadd.f32 %v2088_v39, %v2087_v33  ;;  %v2033_v47 = vrot.slane %v1960_v59, 6  ;;  %v1750_v12 = vrot.slane %v3370_v40, 1  ;;  %v1757_v1 = vrot.slane %v3372_v13, 1 }
 0x37e   : > { %v2071_v44 = vadd.f32 %v2070_v6, %v2069_v20  ;;  %v1961_v38 = vmul.f32 %v1901_v24, %v1737_v0  ;;  %v2032_v2 = vsel %vm2011_vm5, %v2031_v16, %v1958_v21  ;;  %v1743_v35 = vrot.slane %v1742_v61, 1 }
 0x37f   : > { %v2127_v18 = vmul.f32 0.999995, %v2089_v17  ;;  %v2034_v19 = vsel %vm2014_vm6, %v2033_v47, %v2032_v2  ;;  %v1751_v7 = vadd.f32 %v1750_v12, %v3370_v40  ;;  %v1758_v52 = vadd.f32 %v1757_v1, %v3372_v13 }
 0x380   : > { %v2072_v51 = vrot.slane %v2071_v44, 2  ;;  %v2035_v9 = vrot.slane %v1961_v38, 5  ;;  %v1744_v11 = vadd.f32 %v1743_v35, %v1742_v61  ;;  %v1764_v54 = vrot.slane %v3377_v32, 1 }
 0x381   : > { %v2143_v25 = vrot.slane %v2127_v18, 6  ;;  %v1902_v55 = vrot.slane %v1869_v58, 1  ;;  %v1903_v10 = vrot.slane %v1869_v58, 2  ;;  %v1904_v34 = vrot.slane %v1869_v58, 3 }
 0x382   : > { %v2073_v27 = vadd.f32 %v2072_v51, %v2071_v44  ;;  %v2036_v63 = vsel %vm2017_vm7, %v2035_v9, %v2034_v19  ;;  %v1765_v42 = vadd.f32 %v1764_v54, %v3377_v32  ;;  %v1962_v48 = vmul.f32 %v1869_v58, %v1744_v11  ;;  %v1873_v32 = vpop.permute.xlu0 %1872 }
 0x383   : > { %v2090_v49 = vsel %vm1625_vm4, %v2036_v63, 0.0  ;;  %v1963_v40 = vmul.f32 %v1902_v55, %v1751_v7  ;;  %v1964_v29 = vmul.f32 %v1903_v10, %v1758_v52  ;;  %v1770_v13 = vadd.f32 %v1769_v50, %v3374_v28  ;;  %v1877_v55 = vpop.permute.xlu1 %1876 }
 0x384   : > { %v2074_v31 = vrot.slane %v2073_v27, 1  ;;  %v2091_v45 = vrot.slane %v2090_v49, 4  ;;  %v1965_v33 = vmul.f32 %v1904_v34, %v1765_v42  ;;  %v1778_v46 = vrot.slane %v3383_v57, 1 }
 0x385   : > { %v2037_v24 = vrot.slane %v1963_v40, 7  ;;  %v2039_v3 = vrot.slane %v1964_v29, 6  ;;  %v1771_v43 = vrot.slane %v1770_v13, 1  ;;  %v1785_v21 = vrot.slane %v3387_v22, 1 }
 0x386   : > { %v2075_v36 = vadd.f32 %v2074_v31, %v2073_v27  ;;  %v2092_v39 = vadd.f32 %v2091_v45, %v2090_v49  ;;  %v2041_v20 = vrot.slane %v1965_v33, 5  ;;  %v1779_v59 = vadd.f32 %v1778_v46, %v3383_v57 }
 0x387   : > { %v2038_v6 = vsel %vm2011_vm5, %v2037_v24, %v1962_v48  ;;  %v1772_v0 = vadd.f32 %v1771_v43, %v1770_v13  ;;  %v1786_v28 = vadd.f32 %v1785_v21, %v3387_v22  ;;  %v1792_v50 = vrot.slane %v3389_v23, 1 }
 0x388   : > { %v2125_v16 = vmul.f32 0.999995, %v2075_v36  ;;  %v2093_v61 = vrot.slane %v2092_v39, 2  ;;  %v2040_v17 = vsel %vm2014_vm6, %v2039_v3, %v2038_v6  ;;  %v1905_v47 = vrot.slane %v1873_v32, 1 }
 0x389   : > { %v2042_v12 = vsel %vm2017_vm7, %v2041_v20, %v2040_v17  ;;  %v1793_v1 = vadd.f32 %v1792_v50, %v3389_v23  ;;  %v1906_v44 = vrot.slane %v1873_v32, 2  ;;  %v1907_v38 = vrot.slane %v1873_v32, 3 }
 0x38a   : > { %v2142_v57 = vsel %vm2011_vm5, %v2141_v41, %v2125_v16  ;;  %v2094_v2 = vadd.f32 %v2093_v61, %v2092_v39  ;;  %v2097_v22 = vsel %vm1625_vm4, %v2042_v12, 0.0  ;;  %v1966_v35 = vmul.f32 %v1873_v32, %v1772_v0 }
 0x38b   : > { %v2144_v58 = vsel %vm2014_vm6, %v2143_v25, %v2142_v57  ;;  %v2098_v18 = vrot.slane %v2097_v22, 4  ;;  %v1967_v19 = vmul.f32 %v1905_v47, %v1779_v59  ;;  %v1968_v7 = vmul.f32 %v1906_v44, %v1786_v28  ;;  %v1881_v44 = vpop.permute.xlu0 %1880 }
 0x38c   : > { %v2095_v52 = vrot.slane %v2094_v2, 1  ;;  %v1969_v51 = vmul.f32 %v1907_v38, %v1793_v1  ;;  %v1798_v23 = vadd.f32 %v1797_v14, %v3391_v37  ;;  %v1806_v9 = vrot.slane %v3405_v62, 1 }
 0x38d   : > { %v2099_v60 = vadd.f32 %v2098_v18, %v2097_v22  ;;  %v2043_v11 = vrot.slane %v1967_v19, 7  ;;  %v2045_v41 = vrot.slane %v1968_v7, 6  ;;  %v1813_v54 = vrot.slane %v3408_v8, 1 }
 0x38e   : > { %v2096_v10 = vadd.f32 %v2095_v52, %v2094_v2  ;;  %v2047_v34 = vrot.slane %v1969_v51, 5  ;;  %v1799_v25 = vrot.slane %v1798_v23, 1  ;;  %v1807_v27 = vadd.f32 %v1806_v9, %v3405_v62 }
 0x38f   : > { %v2100_v63 = vrot.slane %v2099_v60, 2  ;;  %v2044_v42 = vsel %vm2011_vm5, %v2043_v11, %v1966_v35  ;;  %v1814_v48 = vadd.f32 %v1813_v54, %v3408_v8  ;;  %v1820_v37 = vrot.slane %v3411_v53, 1 }
 0x390   : > { %v2128_v14 = vmul.f32 0.999995, %v2096_v10  ;;  %v2046_v49 = vsel %vm2014_vm6, %v2045_v41, %v2044_v42  ;;  %v1800_v40 = vadd.f32 %v1799_v25, %v1798_v23  ;;  %v1908_v29 = vrot.slane %v1877_v55, 1 }
 0x391   : > { %v2101_v13 = vadd.f32 %v2100_v63, %v2099_v60  ;;  %v2048_v31 = vsel %vm2017_vm7, %v2047_v34, %v2046_v49  ;;  %v1821_v45 = vadd.f32 %v1820_v37, %v3411_v53  ;;  %v1909_v33 = vrot.slane %v1877_v55, 2 }
 0x392   : > { %v2145_v46 = vrot.slane %v2128_v14, 5  ;;  %v2104_v62 = vsel %vm1625_vm4, %v2048_v31, 0.0  ;;  %v1910_v24 = vrot.slane %v1877_v55, 3  ;;  %v1970_v3 = vmul.f32 %v1877_v55, %v1800_v40 }
 0x393   : > { %v2102_v43 = vrot.slane %v2101_v13, 1  ;;  %v2105_v8 = vrot.slane %v2104_v62, 4  ;;  %v1971_v21 = vmul.f32 %v1908_v29, %v1807_v27  ;;  %v1972_v32 = vmul.f32 %v1909_v33, %v1814_v48 }
 0x394   : > { %v2146_v36 = vsel %vm2017_vm7, %v2145_v46, %v2144_v58  ;;  %v1973_v39 = vmul.f32 %v1910_v24, %v1821_v45  ;;  %v1826_v20 = vadd.f32 %v1825_v26, %v3413_v15  ;;  %v1834_v59 = vrot.slane %v3423_v56, 1 }
 0x395   : > { %v2103_v53 = vadd.f32 %v2102_v43, %v2101_v13  ;;  %v2106_v6 = vadd.f32 %v2105_v8, %v2104_v62  ;;  %v2049_v0 = vrot.slane %v1971_v21, 7  ;;  %v2051_v28 = vrot.slane %v1972_v32, 6 }
 0x396   : > { %v2053_v50 = vrot.slane %v1973_v39, 5  ;;  %v1827_v16 = vrot.slane %v1826_v20, 1  ;;  %v1841_v61 = vrot.slane %v3425_v30, 1  ;;  %v1848_v1 = vrot.slane %v3427_v5, 1 }
 0x397   : > { %v2129_v17 = vmul.f32 0.999995, %v2103_v53  ;;  %v2107_v47 = vrot.slane %v2106_v6, 2  ;;  %v2050_v12 = vsel %vm2011_vm5, %v2049_v0, %v1970_v3  ;;  %v1835_v38 = vadd.f32 %v1834_v59, %v3423_v56 }
 0x398   : > { %v2052_v15 = vsel %vm2014_vm6, %v2051_v28, %v2050_v12  ;;  %v1828_v26 = vadd.f32 %v1827_v16, %v1826_v20  ;;  %v1842_v57 = vadd.f32 %v1841_v61, %v3425_v30  ;;  %v1849_v58 = vadd.f32 %v1848_v1, %v3427_v5 }
 0x399   : > { %v2147_v2 = vrot.slane %v2129_v17, 4  ;;  %v2108_v22 = vadd.f32 %v2107_v47, %v2106_v6  ;;  %v2054_v35 = vsel %vm2017_vm7, %v2053_v50, %v2052_v15  ;;  %v1911_v19 = vrot.slane %v1881_v44, 1 }
 0x39a   : > { %v2111_v18 = vsel %vm1625_vm4, %v2054_v35, 0.0  ;;  %v1912_v7 = vrot.slane %v1881_v44, 2  ;;  %v1913_v52 = vrot.slane %v1881_v44, 3  ;;  %v1974_v54 = vmul.f32 %v1881_v44, %v1828_v26 }
 0x39b   : > { %v2149_v51 = vsel %vm2148_vm8, %v2147_v2, %v2146_v36  ;;  %v2109_v23 = vrot.slane %v2108_v22, 1  ;;  %v2112_v9 = vrot.slane %v2111_v18, 4  ;;  %v1975_v60 = vmul.f32 %v1911_v19, %v1835_v38 }
 0x39c   : > { %v1976_v11 = vmul.f32 %v1912_v7, %v1842_v57  ;;  %v1977_v56 = vmul.f32 %v1913_v52, %v1849_v58  ;;  %v2246_v39 = vand.u32 127, %v415_v4 }
 0x39d   : > { %v2110_v41 = vadd.f32 %v2109_v23, %v2108_v22  ;;  %v2113_v30 = vadd.f32 %v2112_v9, %v2111_v18  ;;  %v2055_v55 = vrot.slane %v1975_v60, 7 }
 0x39e   : > { %v2057_v10 = vrot.slane %v1976_v11, 6  ;;  %v2059_v27 = vrot.slane %v1977_v56, 5  ;;  %vm2249_vm12 = vcmp.lt.s32.totalorder %v2246_v39, 24 }
 0x39f   : > { %v2130_v34 = vmul.f32 0.999995, %v2110_v41  ;;  %v2114_v25 = vrot.slane %v2113_v30, 2  ;;  %v2056_v5 = vsel %vm2011_vm5, %v2055_v55, %v1974_v54 }
 0x3a0   : > { %v2058_v48 = vsel %vm2014_vm6, %v2057_v10, %v2056_v5 }
 0x3a1   : > { %v2150_v63 = vrot.slane %v2130_v34, 3  ;;  %v2115_v42 = vadd.f32 %v2114_v25, %v2113_v30  ;;  %v2060_v37 = vsel %vm2017_vm7, %v2059_v27, %v2058_v48 }
 0x3a2   : > { %v2118_v40 = vsel %vm1625_vm4, %v2060_v37, 0.0 }
 0x3a3   : > { %v2152_v14 = vsel %vm2151_vm9, %v2150_v63, %v2149_v51  ;;  %v2116_v49 = vrot.slane %v2115_v42, 1  ;;  %v2119_v29 = vrot.slane %v2118_v40, 4 }
 0x3a5   : > { %v2117_v13 = vadd.f32 %v2116_v49, %v2115_v42  ;;  %v2120_v31 = vadd.f32 %v2119_v29, %v2118_v40 }
 0x3a7   : > { %v2131_v45 = vmul.f32 0.999995, %v2117_v13  ;;  %v2121_v33 = vrot.slane %v2120_v31, 2 }
 0x3a9   : > { %v2153_v46 = vrot.slane %v2131_v45, 2  ;;  %v2122_v62 = vadd.f32 %v2121_v33, %v2120_v31 }
 0x3ab   : > { %v2155_v24 = vsel %vm2154_vm10, %v2153_v46, %v2152_v14  ;;  %v2123_v3 = vrot.slane %v2122_v62, 1 }
 0x3ad   : > { %v2124_v43 = vadd.f32 %v2123_v3, %v2122_v62 }
 0x3af   : > { %v2132_v8 = vmul.f32 0.999995, %v2124_v43 }
 0x3b1   : > { %v2156_v21 = vrot.slane %v2132_v8, 1 }
 0x3b3   : > { %v2158_v32 = vsel %vm2157_vm11, %v2156_v21, %v2155_v24 }
 0x3b4   : > { %2160 = vst.msk [vmem:[#allocation2] sm:$0xff] %vm322_vm2, %v2158_v32 }
 0x3bb   : > { %v2164_v36 = vld [vmem:[#allocation2] sm:$0xff] }
 0x3bc   : > { %2505 = vmatmul.mubr.msk.f32.vlgmr.msra.gmra.mrb[8].mxu1 %vm322_vm2, %v2164_v36 }
 0x48f   : > { %v2240_v20 = vpop.f32.mrb[8].mxu1 }
 0x490   : > { %v2506_v59 = vpop.f32.mrb[9].mxu1  ;;  %v2250_v53 = vsel %vm2249_vm12, %v2240_v20, -1e+30 }
 0x491   : > { %2251 = vmax.xlane.f32.xlu1 %v2250_v53 }
 0x51e   : > { %v2252_v6 = vpop.xlane.xlu1 %2251 }
 0x51f   : > { %v2253_v0 = vsub.f32 %v2250_v53, %v2252_v6 }
 0x521   : > { %v2254_v28 = vmul.f32 1.442695, %v2253_v0 }
 0x523   : > { %2599 = vpow2.f32 %v2254_v28 }
 0x52d   : > { %v2600_v50 = vpop.eup %2599 }
 0x52e   : > { %2256 = vadd.xlane.f32.xlu0 %v2600_v50 }
 0x5bb   : > { %v2257_v16 = vpop.xlane.xlu0 %2256 }
 0x5bc   : > { %2601 = vrcp.f32 %v2257_v16 }
 0x5c6   : > { %v2602_v4 = vpop.eup %2601 }
 0x5c7   : > { %v2259_v61 = vmul.f32 %v2602_v4, %v2600_v50 }
 0x5c9   : > { %2260 = vst [vmem:[%s298_s26] sm:$0xff] %v2259_v61 }
 0x5ca   : > { %2704 = shalt.err (!%p2701_p11)
}
 0x5cb   : > { %s2705_s14 = scalar_lea.hbm %s3543_s9, 128  ;;  %s2709_s6 = scalar_lea.hbm %s3596_s4, 256 }
 0x5cc   : > { %p2706_p9 = scmp.ne.s32.totalorder %s3543_s9, %s2705_s14  ;;  %p2710_p13 = scmp.lt.u32.totalorder %s3543_s9, %s3596_s4 }
 0x5cd   : > { %p2711_p10 = scmp.lt.u32.totalorder %s2709_s6, %s2705_s14  ;;  %p2713_p7 = scmp.lt.u32.totalorder %s2705_s14, %s3543_s9 }
 0x5ce   : > { %p2707_p8 = pnand %p2706_p9, %p3613_p2 }
 0x5cf   : > { %p2712_p1 = por %p2711_p10, %p2710_p13 }
 0x5d0   : > { %p2708_p5 = pneg %p2707_p8 }
 0x5d1   : > { %p2714_p12 = por %p2713_p7, %p2712_p1 }
 0x5d3   : > { %p2715_p0 = pnand %p2714_p12, %p2708_p5 }
 0x5d5   : > { %2718 = shalt.err (!%p2715_p0)
}
 0x5d6   : > { %2515 = dma.vmem_to_hbm [thread:$0]  (%p3613_p2), %s3545_s29, 128, %s3543_s9, %s2262_s25  }
 0x5d7 PF: > { %s2289_s23 = sand.u32 1, %s2761_s15   ;;  %p3614_p3 = scmp.ne.s32.totalorder %s3604_s8, 0 }
 0x5d8   : > { %p3615_p4 = scmp.ge.s32.totalorder %s2781_s20, 2  ;;  %s2290_s26 = scalar_lea.sflag [#allocation7], %s2289_s23 }
 0x5da   : > { %p2529_p6 = pnand %p3615_p4, %p3614_p3 }
 0x5dc   : > { %2756 = dma.done.wait (!%p2529_p6), %s2290_s26, 128  }
 0x5dd   : > { %2758 = vsyncadd (!%p2529_p6), %s2290_s26, 4294967168  ;;  %s21_s20 = sadd.s32 1, %s2781_s20   ;;  %s3616_s15 = smov %s2765_s16 }
 0x5de   : > { %p18_p11 = scmp.ge.s32.totalorder %s21_s20, 4   ;;  %s3617_s16 = smov %s2769_s17 }
 0x5df   : > { %s3618_s17 = smov %s2872_s27  ;;  %s3619_s18 = smov %s2777_s19 }
 0x5e0   : > { %s3620_s19 = smov %s3622_s21  ;;  %20 = sbr.rel (!%p18_p11) target bundleno = 7 (0x7), region = 103 }
 0x5e7   :  { %2295 = vsyncpa [#allocation6], 1 }
 0x5e8   :  { %2297 = vsyncpa [#allocation6 + $0x1], 1 }
 0x5e9   :  { %2298 = vsyncpa [#allocation9], 1 }
 0x5ea   :  { %2299 = vsyncpa [#allocation7], 1 }
 0x5eb   :  { %2301 = vsyncpa [#allocation7 + $0x1], 1 }

</bundles_post_ra>
